<compile_context>
chip_gen: v7x
topology: tpu7x:2x2x1
jax: 0.10.0
libtpu: 0.0.40
codegen_flags: <defaults>
</compile_context>

<pallas_src>
import functools
import math

import jax
import jax.numpy as jnp
from jax import lax
from jax.experimental import pallas as pl
from jax.experimental.pallas import tpu as pltpu


# ---------------------------------------------------------------------------
# Fused kernel: linear chain (accumulated over hidden-dim tiles) + per-image
# matmul chain + ReLU, for a block of G images per grid step.
#   grid = (N // G, H4 // TK); axis 0 parallel over image tiles, axis 1 is the
#   hidden-dim reduction (innermost).
# ---------------------------------------------------------------------------
def _rosi_fused_kernel(x_ref, x3_ref, w1_ref, w2_ref, beff_ref, o_ref, s_acc,
                       *, G, H, W, inv_h):
    k = pl.program_id(1)

    @pl.when(k == 0)
    def _init():
        s_acc[...] = jnp.zeros_like(s_acc)

    # Bias-free accumulation over hidden-dim tiles:
    #   x @ W1^T @ W2^T = sum_k (x @ W1t[:, kt]) @ W2t[kt, :]
    h1 = jnp.dot(x_ref[...], w1_ref[...], preferred_element_type=jnp.float32)
    s_acc[...] += jnp.dot(h1, w2_ref[...], preferred_element_type=jnp.float32)

    @pl.when(k == pl.num_programs(1) - 1)
    def _chain():
        # Folded bias b_eff = b1 @ W2^T + b2 added exactly once.
        S3 = (s_acc[...] + beff_ref[...]).reshape(G, H, W)
        X3 = x3_ref[...]                      # already (G, H, W): no relayout
        # out_g = X_g @ S_g @ S_g, batched over the G images of this block.
        dn = (((2,), (1,)), ((0,), (0,)))     # contract last(lhs)/first(rhs)
        m = lax.dot_general(X3, S3, dn, preferred_element_type=jnp.float32)
        out3 = lax.dot_general(m, S3, dn, preferred_element_type=jnp.float32)
        # Lane-dense (G, H*W) store with fused 1/h scale + ReLU.
        o_ref[...] = jnp.maximum(out3.reshape(G, H * W) * inv_h,
                                 0.0).astype(o_ref.dtype)


def _round_up(v, m):
    return ((v + m - 1) // m) * m


def _vmem_budget_bytes():
    """Generation-aware VMEM budget (~75% of physical, capped at 100 MiB)."""
    cap = None
    try:
        info = pltpu.get_tpu_info()
        cap = getattr(info, "vmem_capacity_bytes", None)
    except Exception:
        cap = None
    if not cap:
        cap = 64 << 20   # conservative fallback = v7x physical per-TC VMEM
    return min(int(cap) * 3 // 4, 100 << 20)


def _pick_tiles(N, A, H4, H, W, vmem_budget_bytes):
    """Pick (G images per step, TK hidden tile) within the VMEM budget."""
    f32 = 4
    pHW = _round_up(H, 8) * _round_up(W, 128) * f32   # padded per-image bytes

    def fits(g, tk):
        wts = 2 * 2 * A * tk * f32      # W1^T + W2^T tiles, double-buffered
        xflat = 2 * g * A * f32         # x flat block, double-buffered
        x3 = 2 * g * pHW                # x 3-D block (lane-padded)
        outb = 2 * g * A * f32          # output block
        sacc = g * A * f32              # accumulator scratch
        temps = 4 * g * pHW             # S3 / m / out3 epilogue temporaries
        bias = 2 * A * f32
        return wts + xflat + x3 + outb + sacc + temps + bias <= vmem_budget_bytes

    # Image-tile candidates: multiples of 8 dividing N, up to 256.
    g_cands = [g for g in range(8, min(256, N) + 1, 8) if N % g == 0]
    if not g_cands:
        g_cands = [N]
    # Prefer >= 2 image tiles (v7x dual TC / megacore), then the largest G
    # (fills the MXU M dim, divides any weight re-streaming).
    g_cands.sort(key=lambda g: (0 if N // g >= 2 else 1, -g))

    # Hidden-tile candidates: full H4 first (weights stay VMEM-resident and
    # are DMA'd only once), then multiples of 128 dividing H4.
    tk_cands = [H4] + [tk for tk in range(min(2048, H4), 127, -128)
                       if H4 % tk == 0]

    for g in g_cands:
        for tk in tk_cands:
            if fits(g, tk):
                return g, tk
    # Minimal-footprint fallback.
    return min(g_cands), min(tk_cands)


def rosi_forward(x, w1, b1, w2, b2, image_size):
    """x: (B, C, H, W) float32; weights in torch nn.Linear layout (out, in)."""
    B, C, Himg, Wimg = x.shape
    assert Himg == Wimg == image_size, "square spatial dims required"
    N = B * C
    A = image_size * image_size
    H4 = 4 * A

    x_flat = x.reshape(N, A).astype(jnp.float32)
    x_3d = x.reshape(N, image_size, image_size).astype(jnp.float32)
    w1t = jnp.asarray(w1, jnp.float32).T                       # (A, 4A)
    w2t = jnp.asarray(w2, jnp.float32).T                       # (4A, A)
    # Fold the first-layer bias through the second linear (exact identity):
    #   (x @ W1^T + b1) @ W2^T + b2 = x @ W1^T @ W2^T + (b1 @ W2^T + b2)
    b_eff = (jnp.asarray(b1, jnp.float32)[None, :] @ w2t
             + jnp.asarray(b2, jnp.float32)[None, :])          # (1, A)

    vmem_budget = _vmem_budget_bytes()
    G, TK = _pick_tiles(N, A, H4, image_size, image_size, vmem_budget)
    n_tiles = N // G
    k_tiles = H4 // TK

    kernel = functools.partial(
        _rosi_fused_kernel,
        G=G, H=image_size, W=image_size, inv_h=1.0 / float(image_size))

    # Scheduling hint: 2 linear matmuls + 2 per-image chain matmuls.
    flops = 4 * N * A * H4 + 4 * N * image_size ** 3
    bytes_accessed = 4 * (2 * A * H4 + A + 3 * N * A)
    cost = pl.CostEstimate(flops=flops, transcendentals=0,
                           bytes_accessed=bytes_accessed)

    out_flat = pl.pallas_call(
        kernel,
        out_shape=jax.ShapeDtypeStruct((N, A), jnp.float32),
        grid_spec=pltpu.PrefetchScalarGridSpec(
            num_scalar_prefetch=0,
            grid=(n_tiles, k_tiles),
            in_specs=[
                pl.BlockSpec((G, A), lambda n, k: (n, 0)),      # x (flat)
                pl.BlockSpec((G, image_size, image_size),
                             lambda n, k: (n, 0, 0)),           # x (G,H,W)
                pl.BlockSpec((A, TK), lambda n, k: (0, k)),     # W1^T tile
                pl.BlockSpec((TK, A), lambda n, k: (k, 0)),     # W2^T tile
                pl.BlockSpec((1, A), lambda n, k: (0, 0)),      # folded bias
            ],
            out_specs=pl.BlockSpec((G, A), lambda n, k: (n, 0)),
            scratch_shapes=[pltpu.VMEM((G, A), jnp.float32)],
        ),
        compiler_params=pltpu.CompilerParams(
            dimension_semantics=("parallel", "arbitrary"),
            vmem_limit_bytes=int(vmem_budget)),
        cost_estimate=cost,
    )(x_flat, x_3d, w1t, w2t, b_eff)

    return out_flat.reshape(B, C, image_size, image_size)


def _reference_forward(x, w1, b1, w2, b2, image_size):
    """Pure-JAX mirror of the PyTorch forward for correctness checking."""
    B, C, H, W = x.shape
    A = H * W
    xf = x.reshape(B, C, A).astype(jnp.float32)
    s = xf @ w1.T + b1
    s = s @ w2.T + b2
    s = s.reshape(B, C, H, W)
    xr = x.astype(jnp.float32)
    inv = 1.0 / math.sqrt(float(image_size))
    m1 = jnp.einsum('bcki,bcjk->bcij', s, xr) * inv          # s^T @ x^T
    out = jnp.einsum('bcki,bckj->bcij', m1, s) * inv         # m1^T @ s
    return jax.nn.relu(out)


if __name__ == "__main__":
    image_size = 16
    B, C = 2, 4
    A = image_size * image_size
    H4 = 4 * A

    key = jax.random.PRNGKey(0)
    kx, k1, k2, k3, k4 = jax.random.split(key, 5)

    x = jax.random.normal(kx, (B, C, image_size, image_size), jnp.float32)

    # Deterministic nn.Linear-style init (uniform(-1/sqrt(fan_in), 1/sqrt(fan_in))).
    bnd1 = 1.0 / math.sqrt(A)
    w1 = jax.random.uniform(k1, (H4, A), jnp.float32, -bnd1, bnd1)   # search1.weight
    b1 = jax.random.uniform(k2, (H4,), jnp.float32, -bnd1, bnd1)     # search1.bias
    bnd2 = 1.0 / math.sqrt(H4)
    w2 = jax.random.uniform(k3, (A, H4), jnp.float32, -bnd2, bnd2)   # search2.weight
    b2 = jax.random.uniform(k4, (A,), jnp.float32, -bnd2, bnd2)      # search2.bias

    out = rosi_forward(x, w1, b1, w2, b2, image_size)
    out = jax.block_until_ready(out)

    ref = _reference_forward(x, w1, b1, w2, b2, image_size)
    if not jnp.allclose(out, ref, rtol=1e-3, atol=1e-4):
        raise AssertionError("Pallas RoSiLayer output mismatch vs reference")

    # TODO(synk): nn.Dropout(p=0.0) is the identity and is intentionally omitted.
    print("KERNEL_OK")
</pallas_src>

<mosaic_0001>
module attributes {stable_mosaic.version = 11 : i64} {
  func.func @_rosi_fused_kernel(%arg0: i32, %arg1: i32, %arg2: memref<8x256xf32, #tpu.memory_space<vmem>>, %arg3: memref<8x16x16xf32, #tpu.memory_space<vmem>>, %arg4: memref<256x1024xf32, #tpu.memory_space<vmem>>, %arg5: memref<1024x256xf32, #tpu.memory_space<vmem>>, %arg6: memref<1x256xf32, #tpu.memory_space<vmem>>, %arg7: memref<8x256xf32, #tpu.memory_space<vmem>>, %arg8: memref<8x256xf32, #tpu.memory_space<vmem>>) attributes {dimension_semantics = [#tpu.dimension_semantics<parallel>, #tpu.dimension_semantics<arbitrary>], iteration_bounds = array<i64: 1, 1>, scalar_prefetch = 0 : i64, scratch_operands = 1 : i64, tpu.core_type = #tpu.core_type<tc>, window_params = [{transform_indices = @transform_0, window_bounds = array<i64: 8, 256>}, {transform_indices = @transform_1, window_bounds = array<i64: 8, 16, 16>}, {transform_indices = @transform_2, window_bounds = array<i64: 256, 1024>}, {transform_indices = @transform_3, window_bounds = array<i64: 1024, 256>}, {pipeline_mode = #tpu.pipeline_mode<synchronous>, transform_indices = @transform_4, window_bounds = array<i64: 1, 256>}, {transform_indices = @transform_5, window_bounds = array<i64: 8, 256>}]} {
    %c0_i32 = arith.constant 0 : i32
    %0 = arith.cmpi eq, %arg1, %c0_i32 : i32
    %1 = arith.extui %0 : i1 to i32
    %c0_i32_0 = arith.constant 0 : i32
    %2 = arith.cmpi ne, %1, %c0_i32_0 : i32
    scf.if %2 {
      %cst_13 = arith.constant 0.000000e+00 : f32
      %14 = vector.broadcast %cst_13 : f32 to vector<8x256xf32>
      %c0_14 = arith.constant 0 : index
      %c0_15 = arith.constant 0 : index
      %15 = vector.load %arg8[%c0_14, %c0_15] : memref<8x256xf32, #tpu.memory_space<vmem>>, vector<8x256xf32>
      tpu.vector_store %arg8[%c0_14, %c0_15], %14 {strides = array<i32>} : memref<8x256xf32, #tpu.memory_space<vmem>>, vector<8x256xf32>,
    } else {
    }
    %c0 = arith.constant 0 : index
    %c0_1 = arith.constant 0 : index
    %3 = vector.load %arg2[%c0, %c0_1] : memref<8x256xf32, #tpu.memory_space<vmem>>, vector<8x256xf32>
    %c0_2 = arith.constant 0 : index
    %c0_3 = arith.constant 0 : index
    %4 = vector.load %arg4[%c0_2, %c0_3] : memref<256x1024xf32, #tpu.memory_space<vmem>>, vector<256x1024xf32>
    %cst = arith.constant dense<0.000000e+00> : vector<8x1024xf32>
    %5 = tpu.matmul %3, %4, %cst {dimension_numbers = #tpu.dot_dimension_numbers<[1], [0], [0], [1], [0, 0, 1, 1], [], []>} : vector<8x256xf32>, vector<256x1024xf32>, vector<8x1024xf32> -> vector<8x1024xf32>
    %c0_4 = arith.constant 0 : index
    %c0_5 = arith.constant 0 : index
    %6 = vector.load %arg8[%c0_4, %c0_5] : memref<8x256xf32, #tpu.memory_space<vmem>>, vector<8x256xf32>
    %c0_6 = arith.constant 0 : index
    %c0_7 = arith.constant 0 : index
    %7 = vector.load %arg5[%c0_6, %c0_7] : memref<1024x256xf32, #tpu.memory_space<vmem>>, vector<1024x256xf32>
    %cst_8 = arith.constant dense<0.000000e+00> : vector<8x256xf32>
    %8 = tpu.matmul %5, %7, %cst_8 {dimension_numbers = #tpu.dot_dimension_numbers<[1], [0], [0], [1], [0, 0, 1, 1], [], []>} : vector<8x1024xf32>, vector<1024x256xf32>, vector<8x256xf32> -> vector<8x256xf32>
    %9 = arith.addf %6, %8 : vector<8x256xf32>
    %c0_9 = arith.constant 0 : index
    %c0_10 = arith.constant 0 : index
    %10 = vector.load %arg8[%c0_9, %c0_10] : memref<8x256xf32, #tpu.memory_space<vmem>>, vector<8x256xf32>
    tpu.vector_store %arg8[%c0_9, %c0_10], %9 {strides = array<i32>} : memref<8x256xf32, #tpu.memory_space<vmem>>, vector<8x256xf32>,
    %c0_i32_11 = arith.constant 0 : i32
    %11 = arith.cmpi eq, %arg1, %c0_i32_11 : i32
    %12 = arith.extui %11 : i1 to i32
    %c0_i32_12 = arith.constant 0 : i32
    %13 = arith.cmpi ne, %12, %c0_i32_12 : i32
    scf.if %13 {
      %c0_13 = arith.constant 0 : index
      %c0_14 = arith.constant 0 : index
      %14 = vector.load %arg8[%c0_13, %c0_14] : memref<8x256xf32, #tpu.memory_space<vmem>>, vector<8x256xf32>
      %c0_15 = arith.constant 0 : index
      %c0_16 = arith.constant 0 : index
      %15 = vector.load %arg6[%c0_15, %c0_16] : memref<1x256xf32, #tpu.memory_space<vmem>>, vector<1x256xf32>
      %16 = vector.broadcast %15 : vector<1x256xf32> to vector<8x256xf32>
      %17 = arith.addf %14, %16 : vector<8x256xf32>
      %18 = vector.shape_cast %17 : vector<8x256xf32> to vector<8x16x16xf32>
      %c0_17 = arith.constant 0 : index
      %c0_18 = arith.constant 0 : index
      %c0_19 = arith.constant 0 : index
      %19 = vector.load %arg3[%c0_17, %c0_18, %c0_19] : memref<8x16x16xf32, #tpu.memory_space<vmem>>, vector<8x16x16xf32>
      %cst_20 = arith.constant dense<0.000000e+00> : vector<8x16x16xf32>
      %20 = tpu.matmul %19, %18, %cst_20 {dimension_numbers = #tpu.dot_dimension_numbers<[2], [1], [1], [2], [0, 0, 0, 1, 1, 2], [0], [0]>} : vector<8x16x16xf32>, vector<8x16x16xf32>, vector<8x16x16xf32> -> vector<8x16x16xf32>
      %cst_21 = arith.constant dense<0.000000e+00> : vector<8x16x16xf32>
      %21 = tpu.matmul %20, %18, %cst_21 {dimension_numbers = #tpu.dot_dimension_numbers<[2], [1], [1], [2], [0, 0, 0, 1, 1, 2], [0], [0]>} : vector<8x16x16xf32>, vector<8x16x16xf32>, vector<8x16x16xf32> -> vector<8x16x16xf32>
      %22 = vector.shape_cast %21 : vector<8x16x16xf32> to vector<8x256xf32>
      %cst_22 = arith.constant 6.250000e-02 : f32
      %23 = vector.broadcast %cst_22 : f32 to vector<8x256xf32>
      %24 = arith.mulf %22, %23 : vector<8x256xf32>
      %cst_23 = arith.constant 0.000000e+00 : f32
      %25 = vector.broadcast %cst_23 : f32 to vector<8x256xf32>
      %26 = arith.maximumf %24, %25 : vector<8x256xf32>
      %c0_24 = arith.constant 0 : index
      %c0_25 = arith.constant 0 : index
      %27 = vector.load %arg7[%c0_24, %c0_25] : memref<8x256xf32, #tpu.memory_space<vmem>>, vector<8x256xf32>
      tpu.vector_store %arg7[%c0_24, %c0_25], %26 {strides = array<i32>} : memref<8x256xf32, #tpu.memory_space<vmem>>, vector<8x256xf32>,
    } else {
    }
    return
  }
  func.func @transform_0(%arg0: i32, %arg1: i32) -> (i32, i32) {
    %c0_i32 = arith.constant 0 : i32
    %c0_i32_0 = arith.constant 0 : i32
    return %arg0, %c0_i32 : i32, i32
  }
  func.func @transform_1(%arg0: i32, %arg1: i32) -> (i32, i32, i32) {
    %c0_i32 = arith.constant 0 : i32
    %c0_i32_0 = arith.constant 0 : i32
    %c0_i32_1 = arith.constant 0 : i32
    return %arg0, %c0_i32, %c0_i32_0 : i32, i32, i32
  }
  func.func @transform_2(%arg0: i32, %arg1: i32) -> (i32, i32) {
    %c0_i32 = arith.constant 0 : i32
    %c0_i32_0 = arith.constant 0 : i32
    return %c0_i32, %arg1 : i32, i32
  }
  func.func @transform_3(%arg0: i32, %arg1: i32) -> (i32, i32) {
    %c0_i32 = arith.constant 0 : i32
    %c0_i32_0 = arith.constant 0 : i32
    return %arg1, %c0_i32 : i32, i32
  }
  func.func @transform_4(%arg0: i32, %arg1: i32) -> (i32, i32) {
    %c0_i32 = arith.constant 0 : i32
    %c0_i32_0 = arith.constant 0 : i32
    %c0_i32_1 = arith.constant 0 : i32
    return %c0_i32, %c0_i32_0 : i32, i32
  }
  func.func @transform_5(%arg0: i32, %arg1: i32) -> (i32, i32) {
    %c0_i32 = arith.constant 0 : i32
    %c0_i32_0 = arith.constant 0 : i32
    return %arg0, %c0_i32 : i32, i32
  }
}

</mosaic_0001>

<bundles_post_ra>
// kernel: tpu_custom_call.1
= control target key start
LH: loop header
LB: loop body
LE: loop exit
PB: predicated region body
PF: predicated region fallthrough
CT: control target
= control target key end

     0   :  { %10 = vsyncpa [#allocation4], 0  ;;  %s4460_s0 = inlined_call_operand.hbm [shape: f32[8,256], index: 0, kind: input, shape index: {}]   ;;  %s4461_s1 = inlined_call_operand.hbm [shape: f32[8,16,16], index: 1, kind: input, shape index: {}]   ;;  %s4462_s2 = inlined_call_operand.hbm [shape: f32[256,1024], index: 2, kind: input, shape index: {}]   ;;  %s4463_s3 = inlined_call_operand.hbm [shape: f32[1024,256], index: 3, kind: input, shape index: {}]   ;;  %s4464_s4 = inlined_call_operand.vmem [shape: f32[1,256], index: 4, kind: input, shape index: {}]   ;;  %s4465_s5 = inlined_call_operand.hbm [shape: f32[8,256], index: 5, kind: output, shape index: {}]  }
   0x1   :  { %11 = vsyncpa [#allocation7], 0 }
   0x2   :  { %12 = vsyncpa [#allocation10], 0 }
   0x3   :  { %13 = vsyncpa [#allocation5], 0  ;;  %s4113_s18 = smov [#allocation6]   ;;  %s3995_s22 = scalar_lea.hbm %s4461_s1, 2048 }
   0x4   :  { %s29_s19 = sshll.u32 %s4113_s18, 4  ;;  %p3996_p0 = scmp.ne.s32.totalorder %s4461_s1, %s3995_s22  ;;  %s30_s19 = int_to_ptr.vmem [resolvable:$true] %s29_s19 }
   0x5   :  { %p3999_p1 = scmp.lt.u32.totalorder %s3995_s22, %s4461_s1 }
   0x7   :  { %p4001_p2 = pnand %p3999_p1, %p3996_p0 }
   0x9   :  { %4004 = shalt.err (!%p4001_p2)
}
   0xa   :  { %s4005_s27 = scalar_lea.vmem %s30_s19, 2048  ;;  %p4010_p4 = scmp.lt.s32.totalorder %s30_s19, %s30_s19 }
   0xb   :  { %p4006_p3 = scmp.ne.s32.totalorder %s30_s19, %s4005_s27  ;;  %p4011_p5 = scmp.lt.s32.totalorder %s4005_s27, %s4005_s27 }
   0xd   :  { %p4012_p6 = por %p4011_p5, %p4010_p4 }
   0xf   :  { %p4013_p7 = pnand %p4012_p6, %p4006_p3 }
  0x11   :  { %4016 = shalt.err (!%p4013_p7)
}
  0x12   :  { %s4114_s28 = smov 128   ;;  %s4115_s29 = smov 8  }
  0x13   :  { %35 = dma.hbm_to_vmem [thread:$0]  %s4461_s1, 2048, %s30_s19, [#allocation7], %s4114_s28, %s4114_s28, %s4115_s29  }
  0x14   :  { %s4116_s7 = smov [#allocation3]   ;;  %s4117_s9 = smov [#allocation8]  }
  0x15   :  { %s20_s8 = sshll.u32 %s4116_s7, 4  ;;  %s41_s10 = sshll.u32 %s4117_s9, 4  ;;  %s21_s8 = int_to_ptr.vmem [resolvable:$true] %s20_s8  ;;  %s42_s10 = int_to_ptr.vmem [resolvable:$true] %s41_s10 }
  0x16   :  { %s4017_s13 = scalar_lea.hbm %s4460_s0, 256 }
  0x17   :  { %p4018_p8 = scmp.ne.s32.totalorder %s4460_s0, %s4017_s13  ;;  %p4021_p9 = scmp.lt.u32.totalorder %s4017_s13, %s4460_s0 }
  0x19   :  { %p4023_p10 = pnand %p4021_p9, %p4018_p8 }
  0x1b   :  { %4026 = shalt.err (!%p4023_p10)
}
  0x1c   :  { %s4027_s1 = scalar_lea.vmem %s21_s8, 256  ;;  %p4032_p12 = scmp.lt.s32.totalorder %s21_s8, %s21_s8 }
  0x1d   :  { %p4028_p11 = scmp.ne.s32.totalorder %s21_s8, %s4027_s1  ;;  %p4033_p13 = scmp.lt.s32.totalorder %s4027_s1, %s4027_s1 }
  0x1f   :  { %p4034_p0 = por %p4033_p13, %p4032_p12 }
  0x21   :  { %p4035_p1 = pnand %p4034_p0, %p4028_p11 }
  0x23   :  { %4038 = shalt.err (!%p4035_p1)
}
  0x24   :  { %23 = dma.hbm_to_vmem [thread:$0]  %s4460_s0, 256, %s21_s8, [#allocation4]  }
  0x25   :  { %s4039_s22 = scalar_lea.hbm %s4462_s2, 32768 }
  0x26   :  { %p4040_p2 = scmp.ne.s32.totalorder %s4462_s2, %s4039_s22  ;;  %p4043_p3 = scmp.lt.u32.totalorder %s4039_s22, %s4462_s2 }
  0x28   :  { %p4045_p4 = pnand %p4043_p3, %p4040_p2 }
  0x2a   :  { %4048 = shalt.err (!%p4045_p4)
}
  0x2b   :  { %s4049_s27 = scalar_lea.vmem %s42_s10, 32768  ;;  %p4054_p6 = scmp.lt.s32.totalorder %s42_s10, %s42_s10 }
  0x2c   :  { %p4050_p5 = scmp.ne.s32.totalorder %s42_s10, %s4049_s27  ;;  %p4055_p7 = scmp.lt.s32.totalorder %s4049_s27, %s4049_s27 }
  0x2e   :  { %p4056_p8 = por %p4055_p7, %p4054_p6 }
  0x30   :  { %p4057_p9 = pnand %p4056_p8, %p4050_p5 }
  0x32   :  { %4060 = shalt.err (!%p4057_p9)
}
  0x33   :  { %s4118_s0 = smov 1024   ;;  %s4119_s28 = smov 64  }
  0x34   :  { %47 = dma.hbm_to_vmem [thread:$0]  %s4462_s2, 32768, %s42_s10, [#allocation7], %s4118_s0, %s4118_s0, %s4119_s28  }
  0x35   :  { %s4120_s6 = smov [#allocation9]   ;;  %s4061_s11 = scalar_lea.hbm %s4463_s3, 32768 }
  0x36   :  { %s53_s7 = sshll.u32 %s4120_s6, 4  ;;  %p4062_p10 = scmp.ne.s32.totalorder %s4463_s3, %s4061_s11  ;;  %s54_s7 = int_to_ptr.vmem [resolvable:$true] %s53_s7 }
  0x37   :  { %p4065_p11 = scmp.lt.u32.totalorder %s4061_s11, %s4463_s3 }
  0x39   :  { %p4067_p12 = pnand %p4065_p11, %p4062_p10 }
  0x3b   :  { %4070 = shalt.err (!%p4067_p12)
}
  0x3c   :  { %s4071_s16 = scalar_lea.vmem %s54_s7, 32768  ;;  %p4076_p0 = scmp.lt.s32.totalorder %s54_s7, %s54_s7 }
  0x3d   :  { %p4072_p13 = scmp.ne.s32.totalorder %s54_s7, %s4071_s16  ;;  %p4077_p1 = scmp.lt.s32.totalorder %s4071_s16, %s4071_s16 }
  0x3f   :  { %p4078_p2 = por %p4077_p1, %p4076_p0 }
  0x41   :  { %p4079_p3 = pnand %p4078_p2, %p4072_p13 }
  0x43   :  { %4082 = shalt.err (!%p4079_p3)
}
  0x44   :  { %s4121_s2 = smov 256   ;;  %s4122_s10 = smov 16  }
  0x45   :  { %59 = dma.hbm_to_vmem [thread:$0]  %s4463_s3, 32768, %s54_s7, [#allocation10], %s4121_s2, %s4121_s2, %s4122_s10  }
  0x46   :  { %4105 = dma.done.wait [#allocation4], 256  }
  0x47   :  { %4106 = vsyncadd [#allocation4], 4294967040 }
  0x48   :  { %4107 = dma.done.wait [#allocation7], 34816  }
  0x49   :  { %4108 = vsyncadd [#allocation7], 4294932480 }
  0x4a   :  { %4109 = dma.done.wait [#allocation10], 32768  }
  0x4b   :  { %4110 = vsyncadd [#allocation10], 4294934528  ;;  %v83_v0 = vld [vmem:[#allocation8 + $0x8] sm:$0xff]  ;;  %v82_v2 = vld [vmem:[#allocation8] sm:$0xff]  ;;  %s4123_s19 = smov 80   ;;  %s4124_s20 = smov 112  }
  0x4c   :  { %v91_v1 = vld [vmem:[#allocation8 + $0x48] sm:$0xff]  ;;  %v90_v4 = vld [vmem:[#allocation8 + $0x40] sm:$0xff]  ;;  %v4211_v41 = vld [vmem:[#allocation3 + $0x8] sm:$0xff]  ;;  %s4125_s21 = smov 96   ;;  %s4127_s22 = smov 48   ;;  %vm1519_vm0 = vcmask 130048  }
  0x4d   :  { %v3395_v3 = vpack.c.bf16 %v91_v1, %v83_v0  ;;  %v99_v5 = vld [vmem:[#allocation8 + $0x88] sm:$0xff]  ;;  %v3397_v7 = vpack.c.bf16 %v90_v4, %v82_v2  ;;  %v98_v9 = vld [vmem:[#allocation8 + $0x80] sm:$0xff]  ;;  %402 = vmatprep.mubr.f32.mxu1 %v4211_v41  ;;  %544 = vmatprep.mubr.f32.mxu0 %v4211_v41  ;;  %vm3145_vm1 = vcmask 261120   ;;  %vm3147_vm2 = vcmask 392192   ;;  %s4130_s23 = smov [#allocation11]  }
  0x4e   :  { %v107_v6 = vld [vmem:[#allocation8 + $0xc8] sm:$0xff]  ;;  %v106_v10 = vld [vmem:[#allocation8 + $0xc0] sm:$0xff]  ;;  %vm3149_vm3 = vcmask 523264   ;;  %vm3151_vm4 = vcmask 654336   ;;  %vm3153_vm5 = vcmask 785408   ;;  %vm3155_vm6 = vcmask 916480  }
  0x4f   :  { %v3399_v8 = vpack.c.bf16 %v107_v6, %v99_v5  ;;  %v115_v11 = vld [vmem:[#allocation8 + $0x108] sm:$0xff]  ;;  %3396 = vmatprep.subr.bf16.mxu1 %v3395_v3  ;;  %v3401_v13 = vpack.c.bf16 %v106_v10, %v98_v9  ;;  %v114_v15 = vld [vmem:[#allocation8 + $0x100] sm:$0xff]  ;;  %s3176_s24 = sshll.u32 %s4130_s23, 4  ;;  %s3177_s24 = int_to_ptr.vmem [resolvable:$true] %s3176_s24 }
  0x50   :  { %v123_v12 = vld [vmem:[#allocation8 + $0x148] sm:$0xff]  ;;  %3398 = vmatpush1.bf16.msra.mxu1 %v3397_v7  ;;  %v122_v16 = vld [vmem:[#allocation8 + $0x140] sm:$0xff]  ;;  %s4083_s25 = scalar_lea.vmem %s3177_s24, 256  ;;  %p4088_p5 = scmp.lt.s32.totalorder %s3177_s24, %s3177_s24 }
  0x51   :  { %3400 = vmatprep.subr.bf16.mxu1 %v3399_v8  ;;  %v3403_v14 = vpack.c.bf16 %v123_v12, %v115_v11  ;;  %v131_v17 = vld [vmem:[#allocation8 + $0x188] sm:$0xff]  ;;  %v3405_v19 = vpack.c.bf16 %v122_v16, %v114_v15  ;;  %v130_v21 = vld [vmem:[#allocation8 + $0x180] sm:$0xff]  ;;  %p4084_p4 = scmp.ne.s32.totalorder %s3177_s24, %s4083_s25  ;;  %p4089_p6 = scmp.lt.s32.totalorder %s4083_s25, %s4083_s25 }
  0x52   :  { %v139_v18 = vld [vmem:[#allocation8 + $0x1c8] sm:$0xff]  ;;  %v138_v22 = vld [vmem:[#allocation8 + $0x1c0] sm:$0xff] }
  0x53   :  { %v3407_v20 = vpack.c.bf16 %v139_v18, %v131_v17  ;;  %v147_v23 = vld [vmem:[#allocation8 + $0x208] sm:$0xff]  ;;  %v3409_v25 = vpack.c.bf16 %v138_v22, %v130_v21  ;;  %v146_v27 = vld [vmem:[#allocation8 + $0x200] sm:$0xff]  ;;  %p4090_p7 = por %p4089_p6, %p4088_p5 }
  0x54   :  { %3402 = vmatpush1.bf16.msra.mxu1 %v3401_v13  ;;  %v155_v24 = vld [vmem:[#allocation8 + $0x248] sm:$0xff]  ;;  %v154_v28 = vld [vmem:[#allocation8 + $0x240] sm:$0xff] }
  0x55   :  { %3404 = vmatprep.subr.bf16.mxu1 %v3403_v14  ;;  %v3411_v26 = vpack.c.bf16 %v155_v24, %v147_v23  ;;  %v163_v29 = vld [vmem:[#allocation8 + $0x288] sm:$0xff]  ;;  %v3413_v31 = vpack.c.bf16 %v154_v28, %v146_v27  ;;  %v162_v33 = vld [vmem:[#allocation8 + $0x280] sm:$0xff]  ;;  %p4091_p8 = pnand %p4090_p7, %p4084_p4 }
  0x56   :  { %v171_v30 = vld [vmem:[#allocation8 + $0x2c8] sm:$0xff]  ;;  %v170_v34 = vld [vmem:[#allocation8 + $0x2c0] sm:$0xff] }
  0x57   :  { %v3415_v32 = vpack.c.bf16 %v171_v30, %v163_v29  ;;  %v179_v35 = vld [vmem:[#allocation8 + $0x308] sm:$0xff]  ;;  %v3417_v37 = vpack.c.bf16 %v170_v34, %v162_v33  ;;  %v178_v39 = vld [vmem:[#allocation8 + $0x300] sm:$0xff] }
  0x58   :  { %3406 = vmatpush1.bf16.msra.mxu1 %v3405_v19  ;;  %v187_v36 = vld [vmem:[#allocation8 + $0x348] sm:$0xff]  ;;  %v186_v40 = vld [vmem:[#allocation8 + $0x340] sm:$0xff] }
  0x59   :  { %3408 = vmatprep.subr.bf16.mxu1 %v3407_v20  ;;  %v3419_v38 = vpack.c.bf16 %v187_v36, %v179_v35  ;;  %v195_v42 = vld [vmem:[#allocation8 + $0x388] sm:$0xff]  ;;  %v3421_v44 = vpack.c.bf16 %v186_v40, %v178_v39  ;;  %v194_v46 = vld [vmem:[#allocation8 + $0x380] sm:$0xff] }
  0x5a   :  { %v203_v43 = vld [vmem:[#allocation8 + $0x3c8] sm:$0xff]  ;;  %v202_v47 = vld [vmem:[#allocation8 + $0x3c0] sm:$0xff] }
  0x5b   :  { %v3423_v45 = vpack.c.bf16 %v203_v43, %v195_v42  ;;  %v211_v48 = vld [vmem:[#allocation8 + $0x408] sm:$0xff]  ;;  %v3425_v50 = vpack.c.bf16 %v202_v47, %v194_v46  ;;  %v210_v52 = vld [vmem:[#allocation8 + $0x400] sm:$0xff] }
  0x5c   :  { %3410 = vmatpush1.bf16.msra.mxu1 %v3409_v25  ;;  %v219_v49 = vld [vmem:[#allocation8 + $0x448] sm:$0xff]  ;;  %v218_v53 = vld [vmem:[#allocation8 + $0x440] sm:$0xff] }
  0x5d   :  { %3412 = vmatprep.subr.bf16.mxu1 %v3411_v26  ;;  %v3427_v51 = vpack.c.bf16 %v219_v49, %v211_v48  ;;  %v227_v54 = vld [vmem:[#allocation8 + $0x488] sm:$0xff]  ;;  %v3429_v56 = vpack.c.bf16 %v218_v53, %v210_v52  ;;  %v226_v58 = vld [vmem:[#allocation8 + $0x480] sm:$0xff] }
  0x5e   :  { %v235_v55 = vld [vmem:[#allocation8 + $0x4c8] sm:$0xff]  ;;  %v234_v59 = vld [vmem:[#allocation8 + $0x4c0] sm:$0xff] }
  0x5f   :  { %v3431_v57 = vpack.c.bf16 %v235_v55, %v227_v54  ;;  %v243_v60 = vld [vmem:[#allocation8 + $0x508] sm:$0xff]  ;;  %v3433_v62 = vpack.c.bf16 %v234_v59, %v226_v58  ;;  %v242_v0 = vld [vmem:[#allocation8 + $0x500] sm:$0xff] }
  0x60   :  { %3414 = vmatpush1.bf16.msra.mxu1 %v3413_v31  ;;  %v251_v61 = vld [vmem:[#allocation8 + $0x548] sm:$0xff]  ;;  %v250_v1 = vld [vmem:[#allocation8 + $0x540] sm:$0xff] }
  0x61   :  { %3416 = vmatprep.subr.bf16.mxu1 %v3415_v32  ;;  %v3435_v63 = vpack.c.bf16 %v251_v61, %v243_v60  ;;  %v259_v2 = vld [vmem:[#allocation8 + $0x588] sm:$0xff]  ;;  %v3437_v4 = vpack.c.bf16 %v250_v1, %v242_v0  ;;  %v258_v6 = vld [vmem:[#allocation8 + $0x580] sm:$0xff]  ;;  %v85_v0 = vld [vmem:[#allocation8 + $0x18] sm:$0xff] }
  0x62   :  { %v267_v3 = vld [vmem:[#allocation8 + $0x5c8] sm:$0xff]  ;;  %v266_v7 = vld [vmem:[#allocation8 + $0x5c0] sm:$0xff]  ;;  %v93_v1 = vld [vmem:[#allocation8 + $0x58] sm:$0xff] }
  0x63   :  { %v3439_v5 = vpack.c.bf16 %v267_v3, %v259_v2  ;;  %v275_v8 = vld [vmem:[#allocation8 + $0x608] sm:$0xff]  ;;  %v274_v10 = vld [vmem:[#allocation8 + $0x600] sm:$0xff]  ;;  %v3441_v14 = vpack.c.bf16 %v266_v7, %v258_v6  ;;  %v3459_v7 = vpack.c.bf16 %v93_v1, %v85_v0 }
  0x64   :  { %3418 = vmatpush1.bf16.msra.mxu1 %v3417_v37  ;;  %v283_v9 = vld [vmem:[#allocation8 + $0x648] sm:$0xff]  ;;  %v282_v11 = vld [vmem:[#allocation8 + $0x640] sm:$0xff] }
  0x65   :  { %3420 = vmatprep.subr.bf16.mxu1 %v3419_v38  ;;  %v87_v12 = vld [vmem:[#allocation8 + $0x28] sm:$0xff]  ;;  %v86_v17 = vld [vmem:[#allocation8 + $0x20] sm:$0xff]  ;;  %v3443_v20 = vpack.c.bf16 %v283_v9, %v275_v8  ;;  %v3445_v30 = vpack.c.bf16 %v282_v11, %v274_v10  ;;  %v84_v8 = vld [vmem:[#allocation8 + $0x10] sm:$0xff] }
  0x66   :  { %v95_v13 = vld [vmem:[#allocation8 + $0x68] sm:$0xff]  ;;  %v94_v18 = vld [vmem:[#allocation8 + $0x60] sm:$0xff]  ;;  %v92_v9 = vld [vmem:[#allocation8 + $0x50] sm:$0xff] }
  0x67   :  { %v291_v15 = vld [vmem:[#allocation8 + $0x688] sm:$0xff]  ;;  %v3523_v16 = vpack.c.bf16 %v95_v13, %v87_v12  ;;  %v3525_v21 = vpack.c.bf16 %v94_v18, %v86_v17  ;;  %v102_v23 = vld [vmem:[#allocation8 + $0xa0] sm:$0xff]  ;;  %v101_v10 = vld [vmem:[#allocation8 + $0x98] sm:$0xff] }
  0x68   :  { %3422 = vmatpush1.bf16.msra.mxu1 %v3421_v44  ;;  %v103_v19 = vld [vmem:[#allocation8 + $0xa8] sm:$0xff]  ;;  %v110_v24 = vld [vmem:[#allocation8 + $0xe0] sm:$0xff]  ;;  %v109_v11 = vld [vmem:[#allocation8 + $0xd8] sm:$0xff] }
  0x69   :  { %3424 = vmatprep.subr.bf16.mxu1 %v3423_v45  ;;  %v111_v22 = vld [vmem:[#allocation8 + $0xe8] sm:$0xff]  ;;  %3524 = vmatprep.subr.bf16.mxu0 %v3523_v16  ;;  %v3529_v29 = vpack.c.bf16 %v110_v24, %v102_v23  ;;  %v290_v31 = vld [vmem:[#allocation8 + $0x680] sm:$0xff]  ;;  %v3461_v16 = vpack.c.bf16 %v92_v9, %v84_v8  ;;  %v100_v17 = vld [vmem:[#allocation8 + $0x90] sm:$0xff] }
  0x6a   :  { %v299_v25 = vld [vmem:[#allocation8 + $0x6c8] sm:$0xff]  ;;  %v3527_v26 = vpack.c.bf16 %v111_v22, %v103_v19  ;;  %3526 = vmatpush1.bf16.msra.mxu0 %v3525_v21  ;;  %v118_v33 = vld [vmem:[#allocation8 + $0x120] sm:$0xff]  ;;  %v108_v21 = vld [vmem:[#allocation8 + $0xd0] sm:$0xff] }
  0x6b   :  { %v119_v27 = vld [vmem:[#allocation8 + $0x128] sm:$0xff]  ;;  %v126_v34 = vld [vmem:[#allocation8 + $0x160] sm:$0xff]  ;;  %v3447_v35 = vpack.c.bf16 %v299_v25, %v291_v15  ;;  %v117_v25 = vld [vmem:[#allocation8 + $0x118] sm:$0xff] }
  0x6c   :  { %3426 = vmatpush1.bf16.msra.mxu1 %v3425_v50  ;;  %v127_v28 = vld [vmem:[#allocation8 + $0x168] sm:$0xff]  ;;  %3528 = vmatprep.subr.bf16.mxu0 %v3527_v26  ;;  %v298_v36 = vld [vmem:[#allocation8 + $0x6c0] sm:$0xff]  ;;  %v3533_v42 = vpack.c.bf16 %v126_v34, %v118_v33  ;;  %v125_v26 = vld [vmem:[#allocation8 + $0x158] sm:$0xff] }
  0x6d   :  { %3428 = vmatprep.subr.bf16.mxu1 %v3427_v51  ;;  %v3531_v32 = vpack.c.bf16 %v127_v28, %v119_v27  ;;  %v135_v37 = vld [vmem:[#allocation8 + $0x1a8] sm:$0xff]  ;;  %v3449_v43 = vpack.c.bf16 %v298_v36, %v290_v31  ;;  %v306_v44 = vld [vmem:[#allocation8 + $0x700] sm:$0xff]  ;;  %v3465_v28 = vpack.c.bf16 %v108_v21, %v100_v17  ;;  %v3467_v33 = vpack.c.bf16 %v125_v26, %v117_v25  ;;  %v124_v34 = vld [vmem:[#allocation8 + $0x150] sm:$0xff] }
  0x6e   :  { %v143_v38 = vld [vmem:[#allocation8 + $0x1e8] sm:$0xff]  ;;  %3530 = vmatpush1.bf16.msra.mxu0 %v3529_v29  ;;  %v134_v46 = vld [vmem:[#allocation8 + $0x1a0] sm:$0xff]  ;;  %v116_v29 = vld [vmem:[#allocation8 + $0x110] sm:$0xff] }
  0x6f   :  { %v307_v39 = vld [vmem:[#allocation8 + $0x708] sm:$0xff]  ;;  %3532 = vmatprep.subr.bf16.mxu0 %v3531_v32  ;;  %v3535_v45 = vpack.c.bf16 %v143_v38, %v135_v37  ;;  %v142_v47 = vld [vmem:[#allocation8 + $0x1e0] sm:$0xff]  ;;  %v133_v37 = vld [vmem:[#allocation8 + $0x198] sm:$0xff] }
  0x70   :  { %3430 = vmatpush1.bf16.msra.mxu1 %v3429_v56  ;;  %v315_v40 = vld [vmem:[#allocation8 + $0x748] sm:$0xff]  ;;  %v314_v49 = vld [vmem:[#allocation8 + $0x740] sm:$0xff]  ;;  %v3537_v54 = vpack.c.bf16 %v142_v47, %v134_v46  ;;  %v141_v38 = vld [vmem:[#allocation8 + $0x1d8] sm:$0xff] }
  0x71   :  { %3432 = vmatprep.subr.bf16.mxu1 %v3431_v57  ;;  %v3451_v48 = vpack.c.bf16 %v315_v40, %v307_v39  ;;  %v151_v50 = vld [vmem:[#allocation8 + $0x228] sm:$0xff]  ;;  %v3453_v55 = vpack.c.bf16 %v314_v49, %v306_v44  ;;  %v322_v56 = vld [vmem:[#allocation8 + $0x780] sm:$0xff]  ;;  %v3469_v40 = vpack.c.bf16 %v124_v34, %v116_v29  ;;  %v3471_v46 = vpack.c.bf16 %v141_v38, %v133_v37  ;;  %v140_v47 = vld [vmem:[#allocation8 + $0x1d0] sm:$0xff] }
  0x72   :  { %v159_v51 = vld [vmem:[#allocation8 + $0x268] sm:$0xff]  ;;  %3534 = vmatpush1.bf16.msra.mxu0 %v3533_v42  ;;  %v150_v58 = vld [vmem:[#allocation8 + $0x220] sm:$0xff]  ;;  %v132_v42 = vld [vmem:[#allocation8 + $0x190] sm:$0xff] }
  0x73   :  { %v323_v52 = vld [vmem:[#allocation8 + $0x788] sm:$0xff]  ;;  %3536 = vmatprep.subr.bf16.mxu0 %v3535_v45  ;;  %v3539_v57 = vpack.c.bf16 %v159_v51, %v151_v50  ;;  %v158_v59 = vld [vmem:[#allocation8 + $0x260] sm:$0xff]  ;;  %v149_v50 = vld [vmem:[#allocation8 + $0x218] sm:$0xff] }
  0x74   :  { %3434 = vmatpush1.bf16.msra.mxu1 %v3433_v62  ;;  %v331_v53 = vld [vmem:[#allocation8 + $0x7c8] sm:$0xff]  ;;  %v330_v61 = vld [vmem:[#allocation8 + $0x7c0] sm:$0xff]  ;;  %v3541_v2 = vpack.c.bf16 %v158_v59, %v150_v58  ;;  %v157_v51 = vld [vmem:[#allocation8 + $0x258] sm:$0xff] }
  0x75   :  { %3436 = vmatprep.subr.bf16.mxu1 %v3435_v63  ;;  %v3455_v60 = vpack.c.bf16 %v331_v53, %v323_v52  ;;  %v167_v62 = vld [vmem:[#allocation8 + $0x2a8] sm:$0xff]  ;;  %v3457_v3 = vpack.c.bf16 %v330_v61, %v322_v56  ;;  %v174_v6 = vld [vmem:[#allocation8 + $0x2e0] sm:$0xff]  ;;  %v3473_v53 = vpack.c.bf16 %v140_v47, %v132_v42  ;;  %v3475_v58 = vpack.c.bf16 %v157_v51, %v149_v50  ;;  %v156_v59 = vld [vmem:[#allocation8 + $0x250] sm:$0xff] }
  0x76   :  { %v175_v63 = vld [vmem:[#allocation8 + $0x2e8] sm:$0xff]  ;;  %3538 = vmatpush1.bf16.msra.mxu0 %v3537_v54  ;;  %v182_v18 = vld [vmem:[#allocation8 + $0x320] sm:$0xff]  ;;  %v148_v54 = vld [vmem:[#allocation8 + $0x210] sm:$0xff] }
  0x77   :  { %3540 = vmatprep.subr.bf16.mxu0 %v3539_v57  ;;  %v183_v12 = vld [vmem:[#allocation8 + $0x328] sm:$0xff]  ;;  %v190_v19 = vld [vmem:[#allocation8 + $0x360] sm:$0xff]  ;;  %v3477_v1 = vpack.c.bf16 %v156_v59, %v148_v54 }
  0x78   :  { %3438 = vmatpush1.bf16.msra.mxu1 %v3437_v4  ;;  %v3543_v4 = vpack.c.bf16 %v175_v63, %v167_v62  ;;  %v191_v13 = vld [vmem:[#allocation8 + $0x368] sm:$0xff]  ;;  %v3549_v27 = vpack.c.bf16 %v190_v19, %v182_v18  ;;  %v198_v31 = vld [vmem:[#allocation8 + $0x3a0] sm:$0xff]  ;;  %v165_v62 = vld [vmem:[#allocation8 + $0x298] sm:$0xff] }
  0x79   :  { %3440 = vmatprep.subr.bf16.mxu1 %v3439_v5  ;;  %v166_v5 = vld [vmem:[#allocation8 + $0x2a0] sm:$0xff]  ;;  %v3547_v22 = vpack.c.bf16 %v191_v13, %v183_v12  ;;  %v199_v23 = vld [vmem:[#allocation8 + $0x3a8] sm:$0xff]  ;;  %v173_v63 = vld [vmem:[#allocation8 + $0x2d8] sm:$0xff] }
  0x7a   :  { %3542 = vmatpush1.bf16.msra.mxu0 %v3541_v2  ;;  %v3545_v15 = vpack.c.bf16 %v174_v6, %v166_v5  ;;  %v207_v24 = vld [vmem:[#allocation8 + $0x3e8] sm:$0xff]  ;;  %v206_v32 = vld [vmem:[#allocation8 + $0x3e0] sm:$0xff]  ;;  %v164_v2 = vld [vmem:[#allocation8 + $0x290] sm:$0xff]  ;;  %v3479_v6 = vpack.c.bf16 %v173_v63, %v165_v62 }
  0x7b   :  { %3544 = vmatprep.subr.bf16.mxu0 %v3543_v4  ;;  %v223_v36 = vld [vmem:[#allocation8 + $0x468] sm:$0xff]  ;;  %v3553_v39 = vpack.c.bf16 %v206_v32, %v198_v31  ;;  %v214_v44 = vld [vmem:[#allocation8 + $0x420] sm:$0xff]  ;;  %v204_v32 = vld [vmem:[#allocation8 + $0x3d0] sm:$0xff] }
  0x7c   :  { %3442 = vmatpush1.bf16.msra.mxu1 %v3441_v14  ;;  %v4215_v14 = vld [vmem:[#allocation3] sm:$0xff]  ;;  %v222_v45 = vld [vmem:[#allocation8 + $0x460] sm:$0xff]  ;;  %v239_v49 = vld [vmem:[#allocation8 + $0x4e8] sm:$0xff] }
  0x7d   :  { %3444 = vmatprep.subr.bf16.mxu1 %v3443_v20  ;;  %v3463_v20 = vpack.c.bf16 %v109_v11, %v101_v10  ;;  %v3557_v52 = vpack.c.bf16 %v222_v45, %v214_v44  ;;  %v230_v56 = vld [vmem:[#allocation8 + $0x4a0] sm:$0xff]  ;;  %v255_v61 = vld [vmem:[#allocation8 + $0x568] sm:$0xff]  ;;  %v181_v10 = vld [vmem:[#allocation8 + $0x318] sm:$0xff] }
  0x7e   :  { %3546 = vmatpush1.bf16.msra.mxu0 %v3545_v15  ;;  %v238_v57 = vld [vmem:[#allocation8 + $0x4e0] sm:$0xff]  ;;  %v263_v8 = vld [vmem:[#allocation8 + $0x5a8] sm:$0xff]  ;;  %v189_v11 = vld [vmem:[#allocation8 + $0x358] sm:$0xff] }
  0x7f   :  { %3548 = vmatprep.subr.bf16.mxu0 %v3547_v22  ;;  %v3561_v0 = vpack.c.bf16 %v238_v57, %v230_v56  ;;  %v246_v4 = vld [vmem:[#allocation8 + $0x520] sm:$0xff]  ;;  %v271_v9 = vld [vmem:[#allocation8 + $0x5e8] sm:$0xff]  ;;  %v180_v15 = vld [vmem:[#allocation8 + $0x310] sm:$0xff]  ;;  %v3483_v19 = vpack.c.bf16 %v189_v11, %v181_v10 }
  0x80   :  { %3446 = vmatpush1.bf16.msra.mxu1 %v3445_v30  ;;  %v3551_v30 = vpack.c.bf16 %v207_v24, %v199_v23  ;;  %v254_v5 = vld [vmem:[#allocation8 + $0x560] sm:$0xff]  ;;  %v279_v21 = vld [vmem:[#allocation8 + $0x628] sm:$0xff]  ;;  %v197_v23 = vld [vmem:[#allocation8 + $0x398] sm:$0xff] }
  0x81   :  { %3448 = vmatprep.subr.bf16.mxu1 %v3447_v35  ;;  %v215_v35 = vld [vmem:[#allocation8 + $0x428] sm:$0xff]  ;;  %v3565_v12 = vpack.c.bf16 %v254_v5, %v246_v4  ;;  %v262_v17 = vld [vmem:[#allocation8 + $0x5a0] sm:$0xff]  ;;  %v205_v24 = vld [vmem:[#allocation8 + $0x3d8] sm:$0xff] }
  0x82   :  { %3550 = vmatpush1.bf16.msra.mxu0 %v3549_v27  ;;  %v270_v18 = vld [vmem:[#allocation8 + $0x5e0] sm:$0xff]  ;;  %v287_v22 = vld [vmem:[#allocation8 + $0x668] sm:$0xff]  ;;  %v196_v27 = vld [vmem:[#allocation8 + $0x390] sm:$0xff]  ;;  %v3487_v31 = vpack.c.bf16 %v205_v24, %v197_v23 }
  0x83   :  { %3552 = vmatprep.subr.bf16.mxu0 %v3551_v30  ;;  %v3569_v25 = vpack.c.bf16 %v270_v18, %v262_v17  ;;  %v278_v29 = vld [vmem:[#allocation8 + $0x620] sm:$0xff]  ;;  %v303_v34 = vld [vmem:[#allocation8 + $0x6e8] sm:$0xff]  ;;  %v3489_v38 = vpack.c.bf16 %v204_v32, %v196_v27  ;;  %v220_v45 = vld [vmem:[#allocation8 + $0x450] sm:$0xff] }
  0x84   :  { %3450 = vmatpush1.bf16.msra.mxu1 %v3449_v43  ;;  %v3555_v43 = vpack.c.bf16 %v223_v36, %v215_v35  ;;  %v286_v30 = vld [vmem:[#allocation8 + $0x660] sm:$0xff]  ;;  %v213_v35 = vld [vmem:[#allocation8 + $0x418] sm:$0xff]  ;;  %v319_v47 = vld [vmem:[#allocation8 + $0x768] sm:$0xff] }
  0x85   :  { %3452 = vmatprep.subr.bf16.mxu1 %v3451_v48  ;;  %v231_v48 = vld [vmem:[#allocation8 + $0x4a8] sm:$0xff]  ;;  %v221_v36 = vld [vmem:[#allocation8 + $0x458] sm:$0xff]  ;;  %v3573_v37 = vpack.c.bf16 %v286_v30, %v278_v29  ;;  %v294_v42 = vld [vmem:[#allocation8 + $0x6a0] sm:$0xff] }
  0x86   :  { %3554 = vmatpush1.bf16.msra.mxu0 %v3553_v39  ;;  %v212_v39 = vld [vmem:[#allocation8 + $0x410] sm:$0xff]  ;;  %v3491_v44 = vpack.c.bf16 %v221_v36, %v213_v35  ;;  %v310_v54 = vld [vmem:[#allocation8 + $0x720] sm:$0xff]  ;;  %v335_v59 = vld [vmem:[#allocation8 + $0x7e8] sm:$0xff] }
  0x87   :  { %3556 = vmatprep.subr.bf16.mxu0 %v3555_v43  ;;  %v302_v43 = vld [vmem:[#allocation8 + $0x6e0] sm:$0xff]  ;;  %v3493_v51 = vpack.c.bf16 %v220_v45, %v212_v39  ;;  %v236_v57 = vld [vmem:[#allocation8 + $0x4d0] sm:$0xff]  ;;  %v635_v32 = vld [vmem:[#allocation9 + $0x58] sm:$0xff] }
  0x88   :  { %3454 = vmatpush1.bf16.msra.mxu1 %v3453_v55  ;;  %v3559_v55 = vpack.c.bf16 %v239_v49, %v231_v48  ;;  %v229_v48 = vld [vmem:[#allocation8 + $0x498] sm:$0xff]  ;;  %v3577_v50 = vpack.c.bf16 %v302_v43, %v294_v42  ;;  %v252_v5 = vld [vmem:[#allocation8 + $0x550] sm:$0xff]  ;;  %v628_v27 = vld [vmem:[#allocation9 + $0x20] sm:$0xff] }
  0x89   :  { %3456 = vmatprep.subr.bf16.mxu1 %v3455_v60  ;;  %v247_v60 = vld [vmem:[#allocation8 + $0x528] sm:$0xff]  ;;  %v237_v49 = vld [vmem:[#allocation8 + $0x4d8] sm:$0xff]  ;;  %v268_v18 = vld [vmem:[#allocation8 + $0x5d0] sm:$0xff] }
  0x8a   :  { %3558 = vmatpush1.bf16.msra.mxu0 %v3557_v52  ;;  %v228_v52 = vld [vmem:[#allocation8 + $0x490] sm:$0xff]  ;;  %v3495_v56 = vpack.c.bf16 %v237_v49, %v229_v48  ;;  %v632_v39 = vld [vmem:[#allocation9 + $0x40] sm:$0xff]  ;;  %v639_v45 = vld [vmem:[#allocation9 + $0x78] sm:$0xff] }
  0x8b   :  { %3560 = vmatprep.subr.bf16.mxu0 %v3559_v55  ;;  %v318_v55 = vld [vmem:[#allocation8 + $0x760] sm:$0xff]  ;;  %v3497_v63 = vpack.c.bf16 %v236_v57, %v228_v52  ;;  %v284_v30 = vld [vmem:[#allocation8 + $0x650] sm:$0xff]  ;;  %v643_v57 = vld [vmem:[#allocation9 + $0x98] sm:$0xff] }
  0x8c   :  { %3458 = vmatpush1.bf16.msra.mxu1 %v3457_v3  ;;  %v3563_v3 = vpack.c.bf16 %v255_v61, %v247_v60  ;;  %v245_v60 = vld [vmem:[#allocation8 + $0x518] sm:$0xff]  ;;  %v3581_v62 = vpack.c.bf16 %v318_v55, %v310_v54  ;;  %v300_v43 = vld [vmem:[#allocation8 + $0x6d0] sm:$0xff]  ;;  %v636_v52 = vld [vmem:[#allocation9 + $0x60] sm:$0xff] }
  0x8d   :  { %3460 = vmatprep.subr.bf16.mxu1 %v3459_v7  ;;  %v172_v7 = vld [vmem:[#allocation8 + $0x2d0] sm:$0xff]  ;;  %v253_v61 = vld [vmem:[#allocation8 + $0x558] sm:$0xff] }
  0x8e   :  { %3562 = vmatpush1.bf16.msra.mxu0 %v3561_v0  ;;  %v3481_v13 = vpack.c.bf16 %v172_v7, %v164_v2  ;;  %v244_v0 = vld [vmem:[#allocation8 + $0x510] sm:$0xff]  ;;  %v326_v2 = vld [vmem:[#allocation8 + $0x7a0] sm:$0xff]  ;;  %v3499_v4 = vpack.c.bf16 %v253_v61, %v245_v60  ;;  %v627_v7 = vld [vmem:[#allocation9 + $0x18] sm:$0xff] }
  0x8f   :  { %403 = vmatmul.mubr.f32.vlgmr.msra.gmra.mrb[0].mxu1 %v4215_v14  ;;  %3564 = vmatprep.subr.bf16.mxu0 %v3563_v3  ;;  %v334_v3 = vld [vmem:[#allocation8 + $0x7e0] sm:$0xff]  ;;  %v3501_v11 = vpack.c.bf16 %v252_v5, %v244_v0  ;;  %v316_v55 = vld [vmem:[#allocation8 + $0x750] sm:$0xff]  ;;  %v647_v5 = vld [vmem:[#allocation9 + $0xb8] sm:$0xff] }
  0x90   :  { %3462 = vmatpush1.bf16.msra.mxu1 %v3461_v16  ;;  %473 = vmatprep.mubr.f32.mxu1 %v4211_v41  ;;  %v3567_v16 = vpack.c.bf16 %v271_v9, %v263_v8  ;;  %v261_v8 = vld [vmem:[#allocation8 + $0x598] sm:$0xff]  ;;  %v3585_v10 = vpack.c.bf16 %v334_v3, %v326_v2  ;;  %v640_v0 = vld [vmem:[#allocation9 + $0x80] sm:$0xff]  ;;  %v332_v3 = vld [vmem:[#allocation8 + $0x7d0] sm:$0xff] }
  0x91   :  { %3464 = vmatprep.subr.bf16.mxu1 %v3463_v20  ;;  %v188_v20 = vld [vmem:[#allocation8 + $0x350] sm:$0xff]  ;;  %v269_v9 = vld [vmem:[#allocation8 + $0x5d8] sm:$0xff] }
  0x92   :  { %3566 = vmatpush1.bf16.msra.mxu0 %v3565_v12  ;;  %v3485_v26 = vpack.c.bf16 %v188_v20, %v180_v15  ;;  %v260_v12 = vld [vmem:[#allocation8 + $0x590] sm:$0xff]  ;;  %v624_v15 = vld [vmem:[#allocation9] sm:$0xff]  ;;  %v3503_v17 = vpack.c.bf16 %v269_v9, %v261_v8  ;;  %v631_v20 = vld [vmem:[#allocation9 + $0x38] sm:$0xff] }
  0x93   :  { %3568 = vmatprep.subr.bf16.mxu0 %v3567_v16  ;;  %v626_v16 = vld [vmem:[#allocation9 + $0x10] sm:$0xff]  ;;  %v3505_v24 = vpack.c.bf16 %v268_v18, %v260_v12  ;;  %v644_v12 = vld [vmem:[#allocation9 + $0xa0] sm:$0xff]  ;;  %v651_v18 = vld [vmem:[#allocation9 + $0xd8] sm:$0xff] }
  0x94   :  { %3466 = vmatpush1.bf16.msra.mxu1 %v3465_v28  ;;  %v3571_v28 = vpack.c.bf16 %v287_v22, %v279_v21  ;;  %v277_v21 = vld [vmem:[#allocation8 + $0x618] sm:$0xff]  ;;  %v3653_v23 = vpack.c.bf16 %v626_v16, %v624_v15  ;;  %v96_v16 = vld [vmem:[#allocation8 + $0x70] sm:$0xff] }
  0x95   :  { %3468 = vmatprep.subr.bf16.mxu1 %v3467_v33  ;;  %v295_v33 = vld [vmem:[#allocation8 + $0x6a8] sm:$0xff]  ;;  %v285_v22 = vld [vmem:[#allocation8 + $0x658] sm:$0xff] }
  0x96   :  { %3570 = vmatpush1.bf16.msra.mxu0 %v3569_v25  ;;  %v276_v25 = vld [vmem:[#allocation8 + $0x610] sm:$0xff]  ;;  %v3507_v29 = vpack.c.bf16 %v285_v22, %v277_v21 }
  0x97   :  { %3572 = vmatprep.subr.bf16.mxu0 %v3571_v28  ;;  %v630_v28 = vld [vmem:[#allocation9 + $0x30] sm:$0xff]  ;;  %v3509_v36 = vpack.c.bf16 %v284_v30, %v276_v25  ;;  %v648_v25 = vld [vmem:[#allocation9 + $0xc0] sm:$0xff]  ;;  %v655_v30 = vld [vmem:[#allocation9 + $0xf8] sm:$0xff] }
  0x98   :  { %3470 = vmatpush1.bf16.msra.mxu1 %v3469_v40  ;;  %v3575_v40 = vpack.c.bf16 %v303_v34, %v295_v33  ;;  %v293_v33 = vld [vmem:[#allocation8 + $0x698] sm:$0xff]  ;;  %v3657_v35 = vpack.c.bf16 %v630_v28, %v628_v27  ;;  %v112_v28 = vld [vmem:[#allocation8 + $0xf0] sm:$0xff] }
  0x99   :  { %3472 = vmatprep.subr.bf16.mxu1 %v3471_v46  ;;  %v311_v46 = vld [vmem:[#allocation8 + $0x728] sm:$0xff]  ;;  %v301_v34 = vld [vmem:[#allocation8 + $0x6d8] sm:$0xff] }
  0x9a   :  { %3574 = vmatpush1.bf16.msra.mxu0 %v3573_v37  ;;  %v292_v37 = vld [vmem:[#allocation8 + $0x690] sm:$0xff]  ;;  %v3511_v42 = vpack.c.bf16 %v301_v34, %v293_v33 }
  0x9b   :  { %3576 = vmatprep.subr.bf16.mxu0 %v3575_v40  ;;  %v634_v40 = vld [vmem:[#allocation9 + $0x50] sm:$0xff]  ;;  %v3513_v49 = vpack.c.bf16 %v300_v43, %v292_v37  ;;  %v652_v37 = vld [vmem:[#allocation9 + $0xe0] sm:$0xff]  ;;  %v659_v43 = vld [vmem:[#allocation9 + $0x118] sm:$0xff] }
  0x9c   :  { %3474 = vmatpush1.bf16.msra.mxu1 %v3473_v53  ;;  %v3579_v53 = vpack.c.bf16 %v319_v47, %v311_v46  ;;  %v309_v46 = vld [vmem:[#allocation8 + $0x718] sm:$0xff]  ;;  %v3661_v48 = vpack.c.bf16 %v634_v40, %v632_v39  ;;  %v128_v40 = vld [vmem:[#allocation8 + $0x170] sm:$0xff] }
  0x9d   :  { %3476 = vmatprep.subr.bf16.mxu1 %v3475_v58  ;;  %v327_v58 = vld [vmem:[#allocation8 + $0x7a8] sm:$0xff]  ;;  %v317_v47 = vld [vmem:[#allocation8 + $0x758] sm:$0xff] }
  0x9e   :  { %3578 = vmatpush1.bf16.msra.mxu0 %v3577_v50  ;;  %v308_v50 = vld [vmem:[#allocation8 + $0x710] sm:$0xff]  ;;  %v3515_v54 = vpack.c.bf16 %v317_v47, %v309_v46 }
  0x9f   :  { %3580 = vmatprep.subr.bf16.mxu0 %v3579_v53  ;;  %v638_v53 = vld [vmem:[#allocation9 + $0x70] sm:$0xff]  ;;  %v3517_v61 = vpack.c.bf16 %v316_v55, %v308_v50  ;;  %v656_v50 = vld [vmem:[#allocation9 + $0x100] sm:$0xff]  ;;  %v663_v55 = vld [vmem:[#allocation9 + $0x138] sm:$0xff] }
  0xa0   :  { %3478 = vmatpush1.bf16.msra.mxu1 %v3477_v1  ;;  %v3583_v1 = vpack.c.bf16 %v335_v59, %v327_v58  ;;  %v325_v58 = vld [vmem:[#allocation8 + $0x798] sm:$0xff]  ;;  %v3665_v60 = vpack.c.bf16 %v638_v53, %v636_v52  ;;  %v144_v53 = vld [vmem:[#allocation8 + $0x1f0] sm:$0xff] }
  0xa1   :  { %3480 = vmatprep.subr.bf16.mxu1 %v3479_v6  ;;  %v625_v6 = vld [vmem:[#allocation9 + $0x8] sm:$0xff]  ;;  %v333_v59 = vld [vmem:[#allocation8 + $0x7d8] sm:$0xff] }
  0xa2   :  { %3582 = vmatpush1.bf16.msra.mxu0 %v3581_v62  ;;  %v324_v62 = vld [vmem:[#allocation8 + $0x790] sm:$0xff]  ;;  %v3519_v2 = vpack.c.bf16 %v333_v59, %v325_v58 }
  0xa3   :  { %3584 = vmatprep.subr.bf16.mxu0 %v3583_v1  ;;  %v642_v1 = vld [vmem:[#allocation9 + $0x90] sm:$0xff]  ;;  %v3521_v9 = vpack.c.bf16 %v332_v3, %v324_v62  ;;  %v169_v3 = vld [vmem:[#allocation8 + $0x2b8] sm:$0xff] }
  0xa4   :  { %3482 = vmatpush1.bf16.msra.mxu1 %v3481_v13  ;;  %v3651_v13 = vpack.c.bf16 %v627_v7, %v625_v6  ;;  %v89_v6 = vld [vmem:[#allocation8 + $0x38] sm:$0xff]  ;;  %v3669_v8 = vpack.c.bf16 %v642_v1, %v640_v0  ;;  %v152_v59 = vld [vmem:[#allocation8 + $0x230] sm:$0xff]  ;;  %v665_v1 = vld [vmem:[#allocation9 + $0x148] sm:$0xff] }
  0xa5   :  { %3484 = vmatprep.subr.bf16.mxu1 %v3483_v19  ;;  %v629_v19 = vld [vmem:[#allocation9 + $0x28] sm:$0xff]  ;;  %v97_v7 = vld [vmem:[#allocation8 + $0x78] sm:$0xff]  ;;  %v662_v62 = vld [vmem:[#allocation9 + $0x130] sm:$0xff] }
  0xa6   :  { %3586 = vmatpush1.bf16.msra.mxu0 %v3585_v10  ;;  %v88_v10 = vld [vmem:[#allocation8 + $0x30] sm:$0xff]  ;;  %v3587_v15 = vpack.c.bf16 %v97_v7, %v89_v6 }
  0xa7   :  { %3652 = vmatprep.subr.bf16.mxu0 %v3651_v13  ;;  %v646_v13 = vld [vmem:[#allocation9 + $0xb0] sm:$0xff]  ;;  %v3589_v22 = vpack.c.bf16 %v96_v16, %v88_v10  ;;  %v185_v16 = vld [vmem:[#allocation8 + $0x338] sm:$0xff] }
  0xa8   :  { %3486 = vmatpush1.bf16.msra.mxu1 %v3485_v26  ;;  %v3655_v26 = vpack.c.bf16 %v631_v20, %v629_v19  ;;  %v105_v19 = vld [vmem:[#allocation8 + $0xb8] sm:$0xff]  ;;  %v3673_v21 = vpack.c.bf16 %v646_v13, %v644_v12  ;;  %v160_v0 = vld [vmem:[#allocation8 + $0x270] sm:$0xff]  ;;  %v669_v13 = vld [vmem:[#allocation9 + $0x168] sm:$0xff] }
  0xa9   :  { %3488 = vmatprep.subr.bf16.mxu1 %v3487_v31  ;;  %v633_v31 = vld [vmem:[#allocation9 + $0x48] sm:$0xff]  ;;  %545 = vmatmul.mubr.f32.vlgmr.msra.gmra.mrb[0].mxu0 %v4215_v14  ;;  %v113_v20 = vld [vmem:[#allocation8 + $0xf8] sm:$0xff]  ;;  %v3605_v6 = vpack.c.bf16 %v160_v0, %v152_v59  ;;  %v168_v7 = vld [vmem:[#allocation8 + $0x2b0] sm:$0xff] }
  0xaa   :  { %3654 = vmatpush1.bf16.msra.mxu0 %v3653_v23  ;;  %v104_v23 = vld [vmem:[#allocation8 + $0xb0] sm:$0xff]  ;;  %v3591_v27 = vpack.c.bf16 %v113_v20, %v105_v19  ;;  %v249_v0 = vld [vmem:[#allocation8 + $0x538] sm:$0xff] }
  0xab   :  { %3656 = vmatprep.subr.bf16.mxu0 %v3655_v26  ;;  %v650_v26 = vld [vmem:[#allocation9 + $0xd0] sm:$0xff]  ;;  %v3593_v34 = vpack.c.bf16 %v112_v28, %v104_v23  ;;  %v201_v28 = vld [vmem:[#allocation8 + $0x3b8] sm:$0xff] }
  0xac   :  { %3490 = vmatpush1.bf16.msra.mxu1 %v3489_v38  ;;  %v3659_v38 = vpack.c.bf16 %v635_v32, %v633_v31  ;;  %v121_v31 = vld [vmem:[#allocation8 + $0x138] sm:$0xff]  ;;  %v3677_v33 = vpack.c.bf16 %v650_v26, %v648_v25  ;;  %v666_v10 = vld [vmem:[#allocation9 + $0x150] sm:$0xff]  ;;  %v673_v26 = vld [vmem:[#allocation9 + $0x188] sm:$0xff] }
  0xad   :  { %3492 = vmatprep.subr.bf16.mxu1 %v3491_v44  ;;  %v637_v44 = vld [vmem:[#allocation9 + $0x68] sm:$0xff]  ;;  %v129_v32 = vld [vmem:[#allocation8 + $0x178] sm:$0xff]  ;;  %v176_v12 = vld [vmem:[#allocation8 + $0x2f0] sm:$0xff] }
  0xae   :  { %3658 = vmatpush1.bf16.msra.mxu0 %v3657_v35  ;;  %v120_v35 = vld [vmem:[#allocation8 + $0x130] sm:$0xff]  ;;  %v3595_v39 = vpack.c.bf16 %v129_v32, %v121_v31  ;;  %v3609_v19 = vpack.c.bf16 %v176_v12, %v168_v7  ;;  %v265_v12 = vld [vmem:[#allocation8 + $0x5b8] sm:$0xff] }
  0xaf   :  { %3660 = vmatprep.subr.bf16.mxu0 %v3659_v38  ;;  %v654_v38 = vld [vmem:[#allocation9 + $0xf0] sm:$0xff]  ;;  %v3597_v47 = vpack.c.bf16 %v128_v40, %v120_v35  ;;  %v217_v40 = vld [vmem:[#allocation8 + $0x438] sm:$0xff] }
  0xb0   :  { %3494 = vmatpush1.bf16.msra.mxu1 %v3493_v51  ;;  %v3663_v51 = vpack.c.bf16 %v639_v45, %v637_v44  ;;  %v137_v44 = vld [vmem:[#allocation8 + $0x1b8] sm:$0xff]  ;;  %v3681_v46 = vpack.c.bf16 %v654_v38, %v652_v37  ;;  %v184_v20 = vld [vmem:[#allocation8 + $0x330] sm:$0xff]  ;;  %v677_v38 = vld [vmem:[#allocation9 + $0x1a8] sm:$0xff] }
  0xb1   :  { %3496 = vmatprep.subr.bf16.mxu1 %v3495_v56  ;;  %v641_v56 = vld [vmem:[#allocation9 + $0x88] sm:$0xff]  ;;  %v145_v45 = vld [vmem:[#allocation8 + $0x1f8] sm:$0xff]  ;;  %v670_v23 = vld [vmem:[#allocation9 + $0x170] sm:$0xff] }
  0xb2   :  { %3662 = vmatpush1.bf16.msra.mxu0 %v3661_v48  ;;  %v136_v48 = vld [vmem:[#allocation8 + $0x1b0] sm:$0xff]  ;;  %v3599_v52 = vpack.c.bf16 %v145_v45, %v137_v44 }
  0xb3   :  { %3664 = vmatprep.subr.bf16.mxu0 %v3663_v51  ;;  %v658_v51 = vld [vmem:[#allocation9 + $0x110] sm:$0xff]  ;;  %v3601_v58 = vpack.c.bf16 %v144_v53, %v136_v48  ;;  %v233_v53 = vld [vmem:[#allocation8 + $0x4b8] sm:$0xff] }
  0xb4   :  { %3498 = vmatpush1.bf16.msra.mxu1 %v3497_v63  ;;  %v3667_v63 = vpack.c.bf16 %v643_v57, %v641_v56  ;;  %v153_v56 = vld [vmem:[#allocation8 + $0x238] sm:$0xff]  ;;  %v192_v25 = vld [vmem:[#allocation8 + $0x370] sm:$0xff] }
  0xb5   :  { %3500 = vmatprep.subr.bf16.mxu1 %v3499_v4  ;;  %v645_v4 = vld [vmem:[#allocation9 + $0xa8] sm:$0xff]  ;;  %v161_v57 = vld [vmem:[#allocation8 + $0x278] sm:$0xff]  ;;  %v3613_v31 = vpack.c.bf16 %v192_v25, %v184_v20  ;;  %v200_v32 = vld [vmem:[#allocation8 + $0x3b0] sm:$0xff] }
  0xb6   :  { %3666 = vmatpush1.bf16.msra.mxu0 %v3665_v60  ;;  %v674_v35 = vld [vmem:[#allocation9 + $0x190] sm:$0xff] }
  0xb7   :  { %3668 = vmatprep.subr.bf16.mxu0 %v3667_v63  ;;  %v3603_v63 = vpack.c.bf16 %v161_v57, %v153_v56  ;;  %v208_v37 = vld [vmem:[#allocation8 + $0x3f0] sm:$0xff] }
  0xb8   :  { %3502 = vmatpush1.bf16.msra.mxu1 %v3501_v11  ;;  %v3671_v11 = vpack.c.bf16 %v647_v5, %v645_v4  ;;  %v177_v4 = vld [vmem:[#allocation8 + $0x2f8] sm:$0xff]  ;;  %v3617_v44 = vpack.c.bf16 %v208_v37, %v200_v32  ;;  %v216_v45 = vld [vmem:[#allocation8 + $0x430] sm:$0xff] }
  0xb9   :  { %3504 = vmatprep.subr.bf16.mxu1 %v3503_v17  ;;  %v649_v17 = vld [vmem:[#allocation9 + $0xc8] sm:$0xff]  ;;  %v678_v48 = vld [vmem:[#allocation9 + $0x1b0] sm:$0xff] }
  0xba   :  { %3670 = vmatpush1.bf16.msra.mxu0 %v3669_v8  ;;  %v232_v57 = vld [vmem:[#allocation8 + $0x4b0] sm:$0xff] }
  0xbb   :  { %3672 = vmatprep.subr.bf16.mxu0 %v3671_v11  ;;  %v3607_v11 = vpack.c.bf16 %v177_v4, %v169_v3  ;;  %v682_v59 = vld [vmem:[#allocation9 + $0x1d0] sm:$0xff] }
  0xbc   :  { %3506 = vmatpush1.bf16.msra.mxu1 %v3505_v24  ;;  %v3675_v24 = vpack.c.bf16 %v651_v18, %v649_v17  ;;  %v193_v17 = vld [vmem:[#allocation8 + $0x378] sm:$0xff]  ;;  %v248_v4 = vld [vmem:[#allocation8 + $0x530] sm:$0xff] }
  0xbd   :  { %3508 = vmatprep.subr.bf16.mxu1 %v3507_v29  ;;  %v653_v29 = vld [vmem:[#allocation9 + $0xe8] sm:$0xff]  ;;  %v686_v7 = vld [vmem:[#allocation9 + $0x1f0] sm:$0xff] }
  0xbe   :  { %3674 = vmatpush1.bf16.msra.mxu0 %v3673_v21  ;;  %v272_v20 = vld [vmem:[#allocation8 + $0x5f0] sm:$0xff] }
  0xbf   :  { %3676 = vmatprep.subr.bf16.mxu0 %v3675_v24  ;;  %v3611_v24 = vpack.c.bf16 %v193_v17, %v185_v16  ;;  %v280_v25 = vld [vmem:[#allocation8 + $0x630] sm:$0xff] }
  0xc0   :  { %3510 = vmatpush1.bf16.msra.mxu1 %v3509_v36  ;;  %v3679_v36 = vpack.c.bf16 %v655_v30, %v653_v29  ;;  %v209_v29 = vld [vmem:[#allocation8 + $0x3f8] sm:$0xff]  ;;  %v304_v32 = vld [vmem:[#allocation8 + $0x6f0] sm:$0xff] }
  0xc1   :  { %3512 = vmatprep.subr.bf16.mxu1 %v3511_v42  ;;  %v657_v42 = vld [vmem:[#allocation9 + $0x108] sm:$0xff]  ;;  %v312_v37 = vld [vmem:[#allocation8 + $0x730] sm:$0xff] }
  0xc2   :  { %3678 = vmatpush1.bf16.msra.mxu0 %v3677_v33 }
  0xc3   :  { %3680 = vmatprep.subr.bf16.mxu0 %v3679_v36  ;;  %v3615_v36 = vpack.c.bf16 %v209_v29, %v201_v28  ;;  %v305_v28 = vld [vmem:[#allocation8 + $0x6f8] sm:$0xff] }
  0xc4   :  { %3514 = vmatpush1.bf16.msra.mxu1 %v3513_v49  ;;  %v3683_v49 = vpack.c.bf16 %v659_v43, %v657_v42  ;;  %v225_v42 = vld [vmem:[#allocation8 + $0x478] sm:$0xff] }
  0xc5   :  { %3516 = vmatprep.subr.bf16.mxu1 %v3515_v54  ;;  %v661_v54 = vld [vmem:[#allocation9 + $0x128] sm:$0xff] }
  0xc6   :  { %3682 = vmatpush1.bf16.msra.mxu0 %v3681_v46  ;;  %v3687_v60 = vpack.c.bf16 %v663_v55, %v661_v54  ;;  %v241_v54 = vld [vmem:[#allocation8 + $0x4f8] sm:$0xff] }
  0xc7   :  { %3684 = vmatprep.subr.bf16.mxu0 %v3683_v49  ;;  %v3619_v49 = vpack.c.bf16 %v225_v42, %v217_v40  ;;  %v337_v40 = vld [vmem:[#allocation8 + $0x7f8] sm:$0xff] }
  0xc8   :  { %3518 = vmatpush1.bf16.msra.mxu1 %v3517_v61  ;;  %v660_v61 = vld [vmem:[#allocation9 + $0x120] sm:$0xff] }
  0xc9   :  { %3520 = vmatprep.subr.bf16.mxu1 %v3519_v2  ;;  %v667_v2 = vld [vmem:[#allocation9 + $0x158] sm:$0xff]  ;;  %v3689_v5 = vpack.c.bf16 %v662_v62, %v660_v61  ;;  %v240_v61 = vld [vmem:[#allocation8 + $0x4f0] sm:$0xff]  ;;  %v685_v62 = vld [vmem:[#allocation9 + $0x1e8] sm:$0xff] }
  0xca   :  { %v3691_v8 = vpack.c.bf16 %v667_v2, %v665_v1  ;;  %v257_v1 = vld [vmem:[#allocation8 + $0x578] sm:$0xff]  ;;  %v3625_v3 = vpack.c.bf16 %v240_v61, %v232_v57  ;;  %v697_v57 = vld [vmem:[#allocation9 + $0x248] sm:$0xff] }
  0xcb   :  { %v701_v61 = vld [vmem:[#allocation9 + $0x268] sm:$0xff] }
  0xcc   :  { %3522 = vmatpush1.bf16.msra.mxu1 %v3521_v9  ;;  %v664_v9 = vld [vmem:[#allocation9 + $0x140] sm:$0xff] }
  0xcd   :  { %3588 = vmatprep.subr.bf16.mxu1 %v3587_v15  ;;  %v671_v15 = vld [vmem:[#allocation9 + $0x178] sm:$0xff]  ;;  %v3693_v18 = vpack.c.bf16 %v666_v10, %v664_v9  ;;  %v256_v9 = vld [vmem:[#allocation8 + $0x570] sm:$0xff]  ;;  %v689_v10 = vld [vmem:[#allocation9 + $0x208] sm:$0xff] }
  0xce   :  { %v3695_v21 = vpack.c.bf16 %v671_v15, %v669_v13  ;;  %v273_v13 = vld [vmem:[#allocation8 + $0x5f8] sm:$0xff]  ;;  %v3629_v16 = vpack.c.bf16 %v256_v9, %v248_v4  ;;  %v709_v9 = vld [vmem:[#allocation9 + $0x2a8] sm:$0xff] }
  0xcf   :  { %474 = vmatmul.mubr.f32.vlgmr.msra.gmra.mrb[2].mxu1 %v4215_v14  ;;  %v707_v4 = vld [vmem:[#allocation9 + $0x298] sm:$0xff] }
  0xd0   :  { %3590 = vmatpush1.bf16.msra.mxu1 %v3589_v22  ;;  %615 = vmatprep.mubr.f32.mxu1 %v4211_v41  ;;  %v3685_v41 = vpack.c.bf16 %v658_v51, %v656_v50  ;;  %v668_v22 = vld [vmem:[#allocation9 + $0x160] sm:$0xff]  ;;  %v224_v50 = vld [vmem:[#allocation8 + $0x470] sm:$0xff]  ;;  %v681_v51 = vld [vmem:[#allocation9 + $0x1c8] sm:$0xff] }
  0xd1   :  { %3592 = vmatprep.subr.bf16.mxu1 %v3591_v27  ;;  %v675_v27 = vld [vmem:[#allocation9 + $0x198] sm:$0xff]  ;;  %v3697_v30 = vpack.c.bf16 %v670_v23, %v668_v22  ;;  %v3621_v56 = vpack.c.bf16 %v224_v50, %v216_v45  ;;  %v336_v45 = vld [vmem:[#allocation8 + $0x7f0] sm:$0xff] }
  0xd2   :  { %3686 = vmatpush1.bf16.msra.mxu0 %v3685_v41  ;;  %v3699_v33 = vpack.c.bf16 %v675_v27, %v673_v26  ;;  %v289_v22 = vld [vmem:[#allocation8 + $0x678] sm:$0xff]  ;;  %v288_v26 = vld [vmem:[#allocation8 + $0x670] sm:$0xff] }
  0xd3   :  { %3688 = vmatprep.subr.bf16.mxu0 %v3687_v60  ;;  %v3623_v60 = vpack.c.bf16 %v241_v54, %v233_v53  ;;  %v297_v27 = vld [vmem:[#allocation8 + $0x6b8] sm:$0xff]  ;;  %v3637_v29 = vpack.c.bf16 %v288_v26, %v280_v25  ;;  %v716_v26 = vld [vmem:[#allocation9 + $0x2e0] sm:$0xff] }
  0xd4   :  { %3594 = vmatpush1.bf16.msra.mxu1 %v3593_v34  ;;  %v672_v34 = vld [vmem:[#allocation9 + $0x180] sm:$0xff]  ;;  %v695_v50 = vld [vmem:[#allocation9 + $0x238] sm:$0xff] }
  0xd5   :  { %3596 = vmatprep.subr.bf16.mxu1 %v3595_v39  ;;  %v679_v39 = vld [vmem:[#allocation9 + $0x1b8] sm:$0xff]  ;;  %v3701_v43 = vpack.c.bf16 %v674_v35, %v672_v34 }
  0xd6   :  { %3690 = vmatpush1.bf16.msra.mxu0 %v3689_v5  ;;  %v3703_v46 = vpack.c.bf16 %v679_v39, %v677_v38  ;;  %v321_v34 = vld [vmem:[#allocation8 + $0x778] sm:$0xff]  ;;  %v320_v38 = vld [vmem:[#allocation8 + $0x770] sm:$0xff] }
  0xd7   :  { %3692 = vmatprep.subr.bf16.mxu0 %v3691_v8  ;;  %v3627_v8 = vpack.c.bf16 %v257_v1, %v249_v0  ;;  %v329_v39 = vld [vmem:[#allocation8 + $0x7b8] sm:$0xff]  ;;  %v3645_v42 = vpack.c.bf16 %v320_v38, %v312_v37  ;;  %v700_v1 = vld [vmem:[#allocation9 + $0x260] sm:$0xff] }
  0xd8   :  { %3598 = vmatpush1.bf16.msra.mxu1 %v3597_v47  ;;  %v676_v47 = vld [vmem:[#allocation9 + $0x1a0] sm:$0xff] }
  0xd9   :  { %3600 = vmatprep.subr.bf16.mxu1 %v3599_v52  ;;  %v683_v52 = vld [vmem:[#allocation9 + $0x1d8] sm:$0xff]  ;;  %v3705_v55 = vpack.c.bf16 %v678_v48, %v676_v47  ;;  %v688_v47 = vld [vmem:[#allocation9 + $0x200] sm:$0xff]  ;;  %v690_v48 = vld [vmem:[#allocation9 + $0x210] sm:$0xff] }
  0xda   :  { %3694 = vmatpush1.bf16.msra.mxu0 %v3693_v18  ;;  %v3707_v41 = vpack.c.bf16 %v683_v52, %v681_v51  ;;  %v3631_v18 = vpack.c.bf16 %v273_v13, %v265_v12  ;;  %v3717_v52 = vpack.c.bf16 %v690_v48, %v688_v47  ;;  %v708_v13 = vld [vmem:[#allocation9 + $0x2a0] sm:$0xff]  ;;  %v733_v47 = vld [vmem:[#allocation9 + $0x368] sm:$0xff]  ;;  %v735_v48 = vld [vmem:[#allocation9 + $0x378] sm:$0xff] }
  0xdb   :  { %3696 = vmatprep.subr.bf16.mxu0 %v3695_v21  ;;  %v281_v21 = vld [vmem:[#allocation8 + $0x638] sm:$0xff]  ;;  %v724_v38 = vld [vmem:[#allocation9 + $0x320] sm:$0xff] }
  0xdc   :  { %3602 = vmatpush1.bf16.msra.mxu1 %v3601_v58  ;;  %v680_v58 = vld [vmem:[#allocation9 + $0x1c0] sm:$0xff] }
  0xdd   :  { %3604 = vmatprep.subr.bf16.mxu1 %v3603_v63  ;;  %v687_v63 = vld [vmem:[#allocation9 + $0x1f8] sm:$0xff]  ;;  %v3709_v2 = vpack.c.bf16 %v682_v59, %v680_v58 }
  0xde   :  { %3698 = vmatpush1.bf16.msra.mxu0 %v3697_v30  ;;  %v3711_v5 = vpack.c.bf16 %v687_v63, %v685_v62  ;;  %v3639_v30 = vpack.c.bf16 %v305_v28, %v297_v27  ;;  %v703_v62 = vld [vmem:[#allocation9 + $0x278] sm:$0xff]  ;;  %v718_v27 = vld [vmem:[#allocation9 + $0x2f0] sm:$0xff]  ;;  %v721_v28 = vld [vmem:[#allocation9 + $0x308] sm:$0xff] }
  0xdf   :  { %3700 = vmatprep.subr.bf16.mxu0 %v3699_v33  ;;  %v313_v33 = vld [vmem:[#allocation8 + $0x738] sm:$0xff]  ;;  %v3727_v0 = vpack.c.bf16 %v703_v62, %v701_v61 }
  0xe0   :  { %3606 = vmatpush1.bf16.msra.mxu1 %v3605_v6  ;;  %v684_v6 = vld [vmem:[#allocation9 + $0x1e0] sm:$0xff] }
  0xe1   :  { %3608 = vmatprep.subr.bf16.mxu1 %v3607_v11  ;;  %v691_v11 = vld [vmem:[#allocation9 + $0x218] sm:$0xff]  ;;  %v3713_v15 = vpack.c.bf16 %v686_v7, %v684_v6  ;;  %v704_v7 = vld [vmem:[#allocation9 + $0x280] sm:$0xff] }
  0xe2   :  { %3702 = vmatpush1.bf16.msra.mxu0 %v3701_v43  ;;  %v3715_v17 = vpack.c.bf16 %v691_v11, %v689_v10  ;;  %v3647_v43 = vpack.c.bf16 %v337_v40, %v329_v39  ;;  %v711_v10 = vld [vmem:[#allocation9 + $0x2b8] sm:$0xff]  ;;  %v726_v39 = vld [vmem:[#allocation9 + $0x330] sm:$0xff]  ;;  %v729_v40 = vld [vmem:[#allocation9 + $0x348] sm:$0xff] }
  0xe3   :  { %3704 = vmatprep.subr.bf16.mxu0 %v3703_v46  ;;  %v3735_v12 = vpack.c.bf16 %v711_v10, %v709_v9 }
  0xe4   :  { %3610 = vmatpush1.bf16.msra.mxu1 %v3609_v19  ;;  %v264_v19 = vld [vmem:[#allocation8 + $0x5b0] sm:$0xff] }
  0xe5   :  { %3612 = vmatprep.subr.bf16.mxu1 %v3611_v24  ;;  %v3633_v23 = vpack.c.bf16 %v272_v20, %v264_v19  ;;  %v3635_v24 = vpack.c.bf16 %v289_v22, %v281_v21  ;;  %v712_v20 = vld [vmem:[#allocation9 + $0x2c0] sm:$0xff]  ;;  %v714_v21 = vld [vmem:[#allocation9 + $0x2d0] sm:$0xff]  ;;  %v717_v22 = vld [vmem:[#allocation9 + $0x2e8] sm:$0xff] }
  0xe6   :  { %3706 = vmatpush1.bf16.msra.mxu0 %v3705_v55  ;;  %v692_v55 = vld [vmem:[#allocation9 + $0x220] sm:$0xff] }
  0xe7   :  { %3708 = vmatprep.subr.bf16.mxu0 %v3707_v41  ;;  %v699_v41 = vld [vmem:[#allocation9 + $0x258] sm:$0xff] }
  0xe8   :  { %3614 = vmatpush1.bf16.msra.mxu1 %v3613_v31  ;;  %v296_v31 = vld [vmem:[#allocation8 + $0x6b0] sm:$0xff]  ;;  %v3723_v59 = vpack.c.bf16 %v699_v41, %v697_v57 }
  0xe9   :  { %3616 = vmatprep.subr.bf16.mxu1 %v3615_v36  ;;  %v3641_v35 = vpack.c.bf16 %v304_v32, %v296_v31  ;;  %v3643_v36 = vpack.c.bf16 %v321_v34, %v313_v33  ;;  %v720_v32 = vld [vmem:[#allocation9 + $0x300] sm:$0xff]  ;;  %v722_v33 = vld [vmem:[#allocation9 + $0x310] sm:$0xff]  ;;  %v725_v34 = vld [vmem:[#allocation9 + $0x328] sm:$0xff] }
  0xea   :  { %3710 = vmatpush1.bf16.msra.mxu0 %v3709_v2  ;;  %v702_v2 = vld [vmem:[#allocation9 + $0x270] sm:$0xff] }
  0xeb   :  { %3712 = vmatprep.subr.bf16.mxu0 %v3711_v5  ;;  %v3729_v5 = vpack.c.bf16 %v702_v2, %v700_v1  ;;  %v745_v1 = vld [vmem:[#allocation9 + $0x3c8] sm:$0xff]  ;;  %v747_v2 = vld [vmem:[#allocation9 + $0x3d8] sm:$0xff] }
  0xec   :  { %3618 = vmatpush1.bf16.msra.mxu1 %v3617_v44  ;;  %v328_v44 = vld [vmem:[#allocation8 + $0x7b0] sm:$0xff] }
  0xed   :  { %3620 = vmatprep.subr.bf16.mxu1 %v3619_v49  ;;  %v3649_v46 = vpack.c.bf16 %v336_v45, %v328_v44  ;;  %v693_v49 = vld [vmem:[#allocation9 + $0x228] sm:$0xff]  ;;  %v728_v45 = vld [vmem:[#allocation9 + $0x340] sm:$0xff] }
  0xee   :  { %3714 = vmatpush1.bf16.msra.mxu0 %v3713_v15  ;;  %v3719_v54 = vpack.c.bf16 %v695_v50, %v693_v49  ;;  %v710_v15 = vld [vmem:[#allocation9 + $0x2b0] sm:$0xff]  ;;  %v3759_v50 = vpack.c.bf16 %v735_v48, %v733_v47  ;;  %v773_v47 = vld [vmem:[#allocation9 + $0x4a8] sm:$0xff]  ;;  %v775_v48 = vld [vmem:[#allocation9 + $0x4b8] sm:$0xff] }
  0xef   :  { %3716 = vmatprep.subr.bf16.mxu0 %v3715_v17  ;;  %v715_v17 = vld [vmem:[#allocation9 + $0x2d8] sm:$0xff] }
  0xf0   :  { %3622 = vmatpush1.bf16.msra.mxu1 %v3621_v56  ;;  %v694_v56 = vld [vmem:[#allocation9 + $0x230] sm:$0xff] }
  0xf1   :  { %3624 = vmatprep.subr.bf16.mxu1 %v3623_v60  ;;  %v3721_v58 = vpack.c.bf16 %v694_v56, %v692_v55  ;;  %v696_v60 = vld [vmem:[#allocation9 + $0x240] sm:$0xff] }
  0xf4   :  { %3626 = vmatpush1.bf16.msra.mxu1 %v3625_v3  ;;  %v705_v3 = vld [vmem:[#allocation9 + $0x288] sm:$0xff] }
  0xf5   :  { %3628 = vmatprep.subr.bf16.mxu1 %v3627_v8  ;;  %v3731_v6 = vpack.c.bf16 %v707_v4, %v705_v3  ;;  %v706_v8 = vld [vmem:[#allocation9 + $0x290] sm:$0xff]  ;;  %v3771_v4 = vpack.c.bf16 %v747_v2, %v745_v1  ;;  %v787_v1 = vld [vmem:[#allocation9 + $0x518] sm:$0xff] }
  0xf6   :  { %v3733_v11 = vpack.c.bf16 %v706_v8, %v704_v7  ;;  %v749_v7 = vld [vmem:[#allocation9 + $0x3e8] sm:$0xff]  ;;  %v751_v8 = vld [vmem:[#allocation9 + $0x3f8] sm:$0xff] }
  0xf7   :  { %v3775_v10 = vpack.c.bf16 %v751_v8, %v749_v7  ;;  %v791_v7 = vld [vmem:[#allocation9 + $0x538] sm:$0xff] }
  0xf8   :  { %3630 = vmatpush1.bf16.msra.mxu1 %v3629_v16  ;;  %v713_v16 = vld [vmem:[#allocation9 + $0x2c8] sm:$0xff] }
  0xf9   :  { %3632 = vmatprep.subr.bf16.mxu1 %v3631_v18  ;;  %v3737_v18 = vpack.c.bf16 %v710_v15, %v708_v13  ;;  %v3739_v19 = vpack.c.bf16 %v715_v17, %v713_v16  ;;  %v753_v13 = vld [vmem:[#allocation9 + $0x408] sm:$0xff]  ;;  %v755_v15 = vld [vmem:[#allocation9 + $0x418] sm:$0xff] }
  0xfa   :  { %v3779_v17 = vpack.c.bf16 %v755_v15, %v753_v13  ;;  %v795_v13 = vld [vmem:[#allocation9 + $0x558] sm:$0xff] }
  0xfc   :  { %3634 = vmatpush1.bf16.msra.mxu1 %v3633_v23  ;;  %v719_v23 = vld [vmem:[#allocation9 + $0x2f8] sm:$0xff] }
  0xfd   :  { %3636 = vmatprep.subr.bf16.mxu1 %v3635_v24  ;;  %v3741_v24 = vpack.c.bf16 %v714_v21, %v712_v20  ;;  %v3743_v25 = vpack.c.bf16 %v719_v23, %v717_v22  ;;  %v757_v20 = vld [vmem:[#allocation9 + $0x428] sm:$0xff]  ;;  %v759_v21 = vld [vmem:[#allocation9 + $0x438] sm:$0xff] }
 0x100   :  { %3638 = vmatpush1.bf16.msra.mxu1 %v3637_v29  ;;  %v723_v29 = vld [vmem:[#allocation9 + $0x318] sm:$0xff] }
 0x101   :  { %3640 = vmatprep.subr.bf16.mxu1 %v3639_v30  ;;  %v3745_v30 = vpack.c.bf16 %v718_v27, %v716_v26  ;;  %v3747_v31 = vpack.c.bf16 %v723_v29, %v721_v28  ;;  %v756_v26 = vld [vmem:[#allocation9 + $0x420] sm:$0xff]  ;;  %v758_v27 = vld [vmem:[#allocation9 + $0x430] sm:$0xff]  ;;  %v761_v28 = vld [vmem:[#allocation9 + $0x448] sm:$0xff] }
 0x102   :  { %v763_v29 = vld [vmem:[#allocation9 + $0x458] sm:$0xff] }
 0x104   :  { %3642 = vmatpush1.bf16.msra.mxu1 %v3641_v35  ;;  %v727_v35 = vld [vmem:[#allocation9 + $0x338] sm:$0xff] }
 0x105   :  { %3644 = vmatprep.subr.bf16.mxu1 %v3643_v36  ;;  %v3749_v36 = vpack.c.bf16 %v722_v33, %v720_v32  ;;  %v3751_v37 = vpack.c.bf16 %v727_v35, %v725_v34  ;;  %v760_v32 = vld [vmem:[#allocation9 + $0x440] sm:$0xff]  ;;  %v762_v33 = vld [vmem:[#allocation9 + $0x450] sm:$0xff]  ;;  %v765_v34 = vld [vmem:[#allocation9 + $0x468] sm:$0xff] }
 0x106   :  { %v767_v35 = vld [vmem:[#allocation9 + $0x478] sm:$0xff] }
 0x108   :  { %3646 = vmatpush1.bf16.msra.mxu1 %v3645_v42  ;;  %v731_v42 = vld [vmem:[#allocation9 + $0x358] sm:$0xff] }
 0x109   :  { %3648 = vmatprep.subr.bf16.mxu1 %v3647_v43  ;;  %v3753_v43 = vpack.c.bf16 %v726_v39, %v724_v38  ;;  %v3755_v44 = vpack.c.bf16 %v731_v42, %v729_v40  ;;  %v764_v38 = vld [vmem:[#allocation9 + $0x460] sm:$0xff]  ;;  %v766_v39 = vld [vmem:[#allocation9 + $0x470] sm:$0xff]  ;;  %v769_v40 = vld [vmem:[#allocation9 + $0x488] sm:$0xff] }
 0x10a   :  { %v771_v42 = vld [vmem:[#allocation9 + $0x498] sm:$0xff] }
 0x10c   :  { %3650 = vmatpush1.bf16.msra.mxu1 %v3649_v46  ;;  %v730_v46 = vld [vmem:[#allocation9 + $0x350] sm:$0xff] }
 0x10d   :  { %v3757_v49 = vpack.c.bf16 %v730_v46, %v728_v45  ;;  %v768_v45 = vld [vmem:[#allocation9 + $0x480] sm:$0xff]  ;;  %v770_v46 = vld [vmem:[#allocation9 + $0x490] sm:$0xff] }
 0x10f   :  { %616 = vmatmul.mubr.f32.vlgmr.msra.gmra.mrb[4].mxu1 %v4215_v14  ;;  %v698_v14 = vld [vmem:[#allocation9 + $0x250] sm:$0xff] }
 0x110   :  { %v3725_v63 = vpack.c.bf16 %v698_v14, %v696_v60  ;;  %v741_v60 = vld [vmem:[#allocation9 + $0x3a8] sm:$0xff]  ;;  %v743_v14 = vld [vmem:[#allocation9 + $0x3b8] sm:$0xff] }
 0x111   :  { %v3767_v62 = vpack.c.bf16 %v743_v14, %v741_v60  ;;  %v783_v60 = vld [vmem:[#allocation9 + $0x4f8] sm:$0xff] }
 0x162   :  { %v404_v51 = vpop.f32.mrb[0].mxu1 }
 0x163   :  { %v406_v53 = vpop.f32.mrb[1].mxu1 }
 0x164   :  { %944 = vmatprep.mubr.f32.mxu0 %v406_v53  ;;  %v737_v53 = vld [vmem:[#allocation9 + $0x388] sm:$0xff] }
 0x165   :  { %945 = vmatmul.mubr.f32.vlgmr.msra.gmra.mrb[2].mxu0 %v404_v51  ;;  %v732_v51 = vld [vmem:[#allocation9 + $0x360] sm:$0xff] }
 0x166   :  { %3718 = vmatpush1.bf16.msra.mxu0 %v3717_v52  ;;  %v734_v52 = vld [vmem:[#allocation9 + $0x370] sm:$0xff] }
 0x167   :  { %3720 = vmatprep.subr.bf16.mxu0 %v3719_v54  ;;  %v739_v54 = vld [vmem:[#allocation9 + $0x398] sm:$0xff]  ;;  %v3761_v56 = vpack.c.bf16 %v734_v52, %v732_v51  ;;  %v772_v51 = vld [vmem:[#allocation9 + $0x4a0] sm:$0xff]  ;;  %v774_v52 = vld [vmem:[#allocation9 + $0x4b0] sm:$0xff] }
 0x168   :  { %v3763_v41 = vpack.c.bf16 %v739_v54, %v737_v53  ;;  %v777_v53 = vld [vmem:[#allocation9 + $0x4c8] sm:$0xff]  ;;  %v779_v54 = vld [vmem:[#allocation9 + $0x4d8] sm:$0xff] }
 0x16a   :  { %3722 = vmatpush1.bf16.msra.mxu0 %v3721_v58  ;;  %v736_v58 = vld [vmem:[#allocation9 + $0x380] sm:$0xff] }
 0x16b   :  { %3724 = vmatprep.subr.bf16.mxu0 %v3723_v59  ;;  %v738_v59 = vld [vmem:[#allocation9 + $0x390] sm:$0xff] }
 0x16c   :  { %v3765_v61 = vpack.c.bf16 %v738_v59, %v736_v58  ;;  %v778_v58 = vld [vmem:[#allocation9 + $0x4d0] sm:$0xff]  ;;  %v781_v59 = vld [vmem:[#allocation9 + $0x4e8] sm:$0xff] }
 0x16e   :  { %3726 = vmatpush1.bf16.msra.mxu0 %v3725_v63  ;;  %v740_v63 = vld [vmem:[#allocation9 + $0x3a0] sm:$0xff] }
 0x16f   :  { %3728 = vmatprep.subr.bf16.mxu0 %v3727_v0  ;;  %v742_v0 = vld [vmem:[#allocation9 + $0x3b0] sm:$0xff] }
 0x170   :  { %v3769_v3 = vpack.c.bf16 %v742_v0, %v740_v63  ;;  %v782_v63 = vld [vmem:[#allocation9 + $0x4f0] sm:$0xff]  ;;  %v785_v0 = vld [vmem:[#allocation9 + $0x508] sm:$0xff] }
 0x172   :  { %3730 = vmatpush1.bf16.msra.mxu0 %v3729_v5  ;;  %v744_v5 = vld [vmem:[#allocation9 + $0x3c0] sm:$0xff] }
 0x173   :  { %3732 = vmatprep.subr.bf16.mxu0 %v3731_v6  ;;  %v746_v6 = vld [vmem:[#allocation9 + $0x3d0] sm:$0xff] }
 0x174   :  { %v3773_v9 = vpack.c.bf16 %v746_v6, %v744_v5  ;;  %v786_v5 = vld [vmem:[#allocation9 + $0x510] sm:$0xff]  ;;  %v789_v6 = vld [vmem:[#allocation9 + $0x528] sm:$0xff] }
 0x176   :  { %3734 = vmatpush1.bf16.msra.mxu0 %v3733_v11  ;;  %v748_v11 = vld [vmem:[#allocation9 + $0x3e0] sm:$0xff] }
 0x177   :  { %3736 = vmatprep.subr.bf16.mxu0 %v3735_v12  ;;  %v750_v12 = vld [vmem:[#allocation9 + $0x3f0] sm:$0xff] }
 0x178   :  { %v3777_v16 = vpack.c.bf16 %v750_v12, %v748_v11  ;;  %v790_v11 = vld [vmem:[#allocation9 + $0x530] sm:$0xff]  ;;  %v793_v12 = vld [vmem:[#allocation9 + $0x548] sm:$0xff] }
 0x17a   :  { %3738 = vmatpush1.bf16.msra.mxu0 %v3737_v18  ;;  %v752_v18 = vld [vmem:[#allocation9 + $0x400] sm:$0xff] }
 0x17b   :  { %3740 = vmatprep.subr.bf16.mxu0 %v3739_v19  ;;  %v754_v19 = vld [vmem:[#allocation9 + $0x410] sm:$0xff] }
 0x17c   :  { %v4223_v55 = vpop.f32.mrb[0].mxu0  ;;  %v3781_v23 = vpack.c.bf16 %v754_v19, %v752_v18  ;;  %v794_v18 = vld [vmem:[#allocation9 + $0x550] sm:$0xff]  ;;  %v797_v19 = vld [vmem:[#allocation9 + $0x568] sm:$0xff] }
 0x17d   :  { %v548_v57 = vpop.f32.mrb[1].mxu0 }
 0x17e   :  { %3742 = vmatpush1.bf16.msra.mxu0 %v3741_v24 }
 0x17f   :  { %3744 = vmatprep.subr.bf16.mxu0 %v3743_v25  ;;  %v3783_v25 = vpack.c.bf16 %v759_v21, %v757_v20  ;;  %v799_v20 = vld [vmem:[#allocation9 + $0x578] sm:$0xff] }
 0x182   :  { %3746 = vmatpush1.bf16.msra.mxu0 %v3745_v30  ;;  %v3785_v30 = vpack.c.bf16 %v758_v27, %v756_v26  ;;  %v803_v26 = vld [vmem:[#allocation9 + $0x598] sm:$0xff] }
 0x183   :  { %3748 = vmatprep.subr.bf16.mxu0 %v3747_v31  ;;  %v3787_v31 = vpack.c.bf16 %v763_v29, %v761_v28  ;;  %v800_v29 = vld [vmem:[#allocation9 + $0x580] sm:$0xff] }
 0x186   :  { %3750 = vmatpush1.bf16.msra.mxu0 %v3749_v36  ;;  %v3789_v36 = vpack.c.bf16 %v762_v33, %v760_v32  ;;  %v807_v32 = vld [vmem:[#allocation9 + $0x5b8] sm:$0xff] }
 0x187   :  { %3752 = vmatprep.subr.bf16.mxu0 %v3751_v37  ;;  %v3791_v37 = vpack.c.bf16 %v767_v35, %v765_v34  ;;  %v804_v35 = vld [vmem:[#allocation9 + $0x5a0] sm:$0xff] }
 0x18a   :  { %3754 = vmatpush1.bf16.msra.mxu0 %v3753_v43  ;;  %v3793_v43 = vpack.c.bf16 %v766_v39, %v764_v38  ;;  %v811_v38 = vld [vmem:[#allocation9 + $0x5d8] sm:$0xff] }
 0x18b   :  { %3756 = vmatprep.subr.bf16.mxu0 %v3755_v44  ;;  %v3795_v44 = vpack.c.bf16 %v771_v42, %v769_v40  ;;  %v808_v42 = vld [vmem:[#allocation9 + $0x5c0] sm:$0xff] }
 0x18e   :  { %3758 = vmatpush1.bf16.msra.mxu0 %v3757_v49  ;;  %v3797_v49 = vpack.c.bf16 %v770_v46, %v768_v45  ;;  %v815_v45 = vld [vmem:[#allocation9 + $0x5f8] sm:$0xff] }
 0x18f   :  { %3760 = vmatprep.subr.bf16.mxu0 %v3759_v50  ;;  %v3799_v50 = vpack.c.bf16 %v775_v48, %v773_v47  ;;  %v812_v48 = vld [vmem:[#allocation9 + $0x5e0] sm:$0xff] }
 0x192   :  { %3762 = vmatpush1.bf16.msra.mxu0 %v3761_v56  ;;  %v3801_v56 = vpack.c.bf16 %v774_v52, %v772_v51  ;;  %v819_v51 = vld [vmem:[#allocation9 + $0x618] sm:$0xff] }
 0x193   :  { %3764 = vmatprep.subr.bf16.mxu0 %v3763_v41  ;;  %v776_v41 = vld [vmem:[#allocation9 + $0x4c0] sm:$0xff] }
 0x194   :  { %v3805_v14 = vpack.c.bf16 %v778_v58, %v776_v41  ;;  %v823_v41 = vld [vmem:[#allocation9 + $0x638] sm:$0xff] }
 0x196   :  { %3766 = vmatpush1.bf16.msra.mxu0 %v3765_v61  ;;  %v3807_v61 = vpack.c.bf16 %v783_v60, %v781_v59 }
 0x197   :  { %3768 = vmatprep.subr.bf16.mxu0 %v3767_v62  ;;  %v780_v62 = vld [vmem:[#allocation9 + $0x4e0] sm:$0xff] }
 0x198   :  { %v3809_v2 = vpack.c.bf16 %v782_v63, %v780_v62  ;;  %v825_v63 = vld [vmem:[#allocation9 + $0x648] sm:$0xff] }
 0x19a   :  { %3770 = vmatpush1.bf16.msra.mxu0 %v3769_v3  ;;  %v3811_v3 = vpack.c.bf16 %v787_v1, %v785_v0  ;;  %v827_v0 = vld [vmem:[#allocation9 + $0x658] sm:$0xff] }
 0x19b   :  { %3772 = vmatprep.subr.bf16.mxu0 %v3771_v4  ;;  %v784_v4 = vld [vmem:[#allocation9 + $0x500] sm:$0xff] }
 0x19c   :  { %v3813_v8 = vpack.c.bf16 %v786_v5, %v784_v4  ;;  %v826_v4 = vld [vmem:[#allocation9 + $0x650] sm:$0xff]  ;;  %v829_v5 = vld [vmem:[#allocation9 + $0x668] sm:$0xff] }
 0x19e   :  { %3774 = vmatpush1.bf16.msra.mxu0 %v3773_v9  ;;  %v3815_v9 = vpack.c.bf16 %v791_v7, %v789_v6  ;;  %v831_v6 = vld [vmem:[#allocation9 + $0x678] sm:$0xff] }
 0x19f   :  { %3776 = vmatprep.subr.bf16.mxu0 %v3775_v10  ;;  %v788_v10 = vld [vmem:[#allocation9 + $0x520] sm:$0xff] }
 0x1a0   :  { %v3817_v15 = vpack.c.bf16 %v790_v11, %v788_v10  ;;  %v830_v10 = vld [vmem:[#allocation9 + $0x670] sm:$0xff]  ;;  %v833_v11 = vld [vmem:[#allocation9 + $0x688] sm:$0xff] }
 0x1a2   :  { %3778 = vmatpush1.bf16.msra.mxu0 %v3777_v16  ;;  %v475_v22 = vpop.f32.mrb[2].mxu1  ;;  %v3819_v16 = vpack.c.bf16 %v795_v13, %v793_v12  ;;  %v835_v12 = vld [vmem:[#allocation9 + $0x698] sm:$0xff] }
 0x1a3   :  { %v477_v24 = vpop.f32.mrb[3].mxu1  ;;  %3780 = vmatprep.subr.bf16.mxu0 %v3779_v17  ;;  %v792_v17 = vld [vmem:[#allocation9 + $0x540] sm:$0xff] }
 0x1a4   :  { %1015 = vmatprep.mubr.f32.mxu0 %v477_v24  ;;  %v3821_v21 = vpack.c.bf16 %v794_v18, %v792_v17  ;;  %v798_v24 = vld [vmem:[#allocation9 + $0x570] sm:$0xff]  ;;  %v837_v17 = vld [vmem:[#allocation9 + $0x6a8] sm:$0xff]  ;;  %v839_v18 = vld [vmem:[#allocation9 + $0x6b8] sm:$0xff] }
 0x1a5   :  { %1016 = vmatmul.mubr.f32.vlgmr.msra.gmra.mrb[2].mxu0 %v475_v22  ;;  %v3823_v22 = vpack.c.bf16 %v799_v20, %v797_v19  ;;  %v3863_v20 = vpack.c.bf16 %v839_v18, %v837_v17  ;;  %v876_v18 = vld [vmem:[#allocation9 + $0x7e0] sm:$0xff] }
 0x1a6   :  { %3782 = vmatpush1.bf16.msra.mxu0 %v3781_v23  ;;  %1086 = vmatprep.mubr.f32.mxu0 %v548_v57  ;;  %v3803_v57 = vpack.c.bf16 %v779_v54, %v777_v53  ;;  %v796_v23 = vld [vmem:[#allocation9 + $0x560] sm:$0xff] }
 0x1a7   :  { %3784 = vmatprep.subr.bf16.mxu0 %v3783_v25  ;;  %v801_v25 = vld [vmem:[#allocation9 + $0x588] sm:$0xff]  ;;  %v3825_v27 = vpack.c.bf16 %v798_v24, %v796_v23  ;;  %v816_v54 = vld [vmem:[#allocation9 + $0x600] sm:$0xff]  ;;  %v843_v24 = vld [vmem:[#allocation9 + $0x6d8] sm:$0xff] }
 0x1a8   :  { %v3827_v28 = vpack.c.bf16 %v803_v26, %v801_v25  ;;  %v841_v23 = vld [vmem:[#allocation9 + $0x6c8] sm:$0xff] }
 0x1a9   :  { %v3867_v26 = vpack.c.bf16 %v843_v24, %v841_v23  ;;  %v1173_v24 = vld [vmem:[%s4464_s4] sm:$0x3]  ;;  %s4126_s4 = smov 32  }
 0x1aa   :  { %3786 = vmatpush1.bf16.msra.mxu0 %v3785_v30  ;;  %v802_v30 = vld [vmem:[#allocation9 + $0x590] sm:$0xff] }
 0x1ab   :  { %3788 = vmatprep.subr.bf16.mxu0 %v3787_v31  ;;  %v805_v31 = vld [vmem:[#allocation9 + $0x5a8] sm:$0xff]  ;;  %v3829_v33 = vpack.c.bf16 %v802_v30, %v800_v29  ;;  %v847_v30 = vld [vmem:[#allocation9 + $0x6f8] sm:$0xff] }
 0x1ac   :  { %v3831_v34 = vpack.c.bf16 %v807_v32, %v805_v31  ;;  %v845_v29 = vld [vmem:[#allocation9 + $0x6e8] sm:$0xff] }
 0x1ad   :  { %v3871_v32 = vpack.c.bf16 %v847_v30, %v845_v29 }
 0x1ae   :  { %3790 = vmatpush1.bf16.msra.mxu0 %v3789_v36  ;;  %v806_v36 = vld [vmem:[#allocation9 + $0x5b0] sm:$0xff] }
 0x1af   :  { %3792 = vmatprep.subr.bf16.mxu0 %v3791_v37  ;;  %v809_v37 = vld [vmem:[#allocation9 + $0x5c8] sm:$0xff]  ;;  %v3833_v39 = vpack.c.bf16 %v806_v36, %v804_v35  ;;  %v851_v36 = vld [vmem:[#allocation9 + $0x718] sm:$0xff] }
 0x1b0   :  { %v3835_v40 = vpack.c.bf16 %v811_v38, %v809_v37  ;;  %v849_v35 = vld [vmem:[#allocation9 + $0x708] sm:$0xff] }
 0x1b1   :  { %v3875_v38 = vpack.c.bf16 %v851_v36, %v849_v35 }
 0x1b2   :  { %3794 = vmatpush1.bf16.msra.mxu0 %v3793_v43  ;;  %v810_v43 = vld [vmem:[#allocation9 + $0x5d0] sm:$0xff] }
 0x1b3   :  { %3796 = vmatprep.subr.bf16.mxu0 %v3795_v44  ;;  %v813_v44 = vld [vmem:[#allocation9 + $0x5e8] sm:$0xff]  ;;  %v3837_v46 = vpack.c.bf16 %v810_v43, %v808_v42  ;;  %v855_v43 = vld [vmem:[#allocation9 + $0x738] sm:$0xff] }
 0x1b4   :  { %v3839_v47 = vpack.c.bf16 %v815_v45, %v813_v44  ;;  %v853_v42 = vld [vmem:[#allocation9 + $0x728] sm:$0xff] }
 0x1b5   :  { %v3879_v45 = vpack.c.bf16 %v855_v43, %v853_v42 }
 0x1b6   :  { %3798 = vmatpush1.bf16.msra.mxu0 %v3797_v49  ;;  %v814_v49 = vld [vmem:[#allocation9 + $0x5f0] sm:$0xff] }
 0x1b7   :  { %3800 = vmatprep.subr.bf16.mxu0 %v3799_v50  ;;  %v817_v50 = vld [vmem:[#allocation9 + $0x608] sm:$0xff]  ;;  %v3841_v52 = vpack.c.bf16 %v814_v49, %v812_v48  ;;  %v859_v49 = vld [vmem:[#allocation9 + $0x758] sm:$0xff] }
 0x1b8   :  { %v3843_v53 = vpack.c.bf16 %v819_v51, %v817_v50  ;;  %v857_v48 = vld [vmem:[#allocation9 + $0x748] sm:$0xff] }
 0x1b9   :  { %v3883_v51 = vpack.c.bf16 %v859_v49, %v857_v48  ;;  %v4129_v48 = vmov 1934713408  }
 0x1ba   :  { %3802 = vmatpush1.bf16.msra.mxu0 %v3801_v56  ;;  %v818_v56 = vld [vmem:[#allocation9 + $0x610] sm:$0xff]  ;;  %v1298_v49 = vunpack.c.l.s4 %v4129_v48 }
 0x1bb   :  { %3804 = vmatprep.subr.bf16.mxu0 %v3803_v57  ;;  %v821_v57 = vld [vmem:[#allocation9 + $0x628] sm:$0xff]  ;;  %v3845_v58 = vpack.c.bf16 %v818_v56, %v816_v54  ;;  %v863_v56 = vld [vmem:[#allocation9 + $0x778] sm:$0xff] }
 0x1bc   :  { %v3847_v60 = vpack.c.bf16 %v823_v41, %v821_v57  ;;  %v861_v54 = vld [vmem:[#allocation9 + $0x768] sm:$0xff] }
 0x1bd   :  { %v3887_v41 = vpack.c.bf16 %v863_v56, %v861_v54 }
 0x1be   :  { %3806 = vmatpush1.bf16.msra.mxu0 %v3805_v14  ;;  %v820_v14 = vld [vmem:[#allocation9 + $0x620] sm:$0xff] }
 0x1bf   :  { %3808 = vmatprep.subr.bf16.mxu0 %v3807_v61  ;;  %v822_v61 = vld [vmem:[#allocation9 + $0x630] sm:$0xff] }
 0x1c0   :  { %v3849_v1 = vpack.c.bf16 %v822_v61, %v820_v14  ;;  %v865_v14 = vld [vmem:[#allocation9 + $0x788] sm:$0xff]  ;;  %v867_v61 = vld [vmem:[#allocation9 + $0x798] sm:$0xff] }
 0x1c2   :  { %3810 = vmatpush1.bf16.msra.mxu0 %v3809_v2  ;;  %v3851_v2 = vpack.c.bf16 %v827_v0, %v825_v63  ;;  %v3891_v63 = vpack.c.bf16 %v867_v61, %v865_v14  ;;  %v864_v0 = vld [vmem:[#allocation9 + $0x780] sm:$0xff] }
 0x1c3   :  { %3812 = vmatprep.subr.bf16.mxu0 %v3811_v3  ;;  %v824_v3 = vld [vmem:[#allocation9 + $0x640] sm:$0xff] }
 0x1c4   :  { %v3853_v7 = vpack.c.bf16 %v826_v4, %v824_v3  ;;  %v871_v3 = vld [vmem:[#allocation9 + $0x7b8] sm:$0xff] }
 0x1c6   :  { %3814 = vmatpush1.bf16.msra.mxu0 %v3813_v8  ;;  %v3855_v8 = vpack.c.bf16 %v831_v6, %v829_v5  ;;  %v868_v6 = vld [vmem:[#allocation9 + $0x7a0] sm:$0xff] }
 0x1c7   :  { %3816 = vmatprep.subr.bf16.mxu0 %v3815_v9  ;;  %v828_v9 = vld [vmem:[#allocation9 + $0x660] sm:$0xff] }
 0x1c8   :  { %v3857_v13 = vpack.c.bf16 %v830_v10, %v828_v9  ;;  %v875_v9 = vld [vmem:[#allocation9 + $0x7d8] sm:$0xff] }
 0x1ca   :  { %3818 = vmatpush1.bf16.msra.mxu0 %v3817_v15  ;;  %v832_v15 = vld [vmem:[#allocation9 + $0x680] sm:$0xff] }
 0x1cb   :  { %3820 = vmatprep.subr.bf16.mxu0 %v3819_v16  ;;  %v834_v16 = vld [vmem:[#allocation9 + $0x690] sm:$0xff] }
 0x1cc   :  { %v3861_v19 = vpack.c.bf16 %v834_v16, %v832_v15  ;;  %v879_v15 = vld [vmem:[#allocation9 + $0x7f8] sm:$0xff] }
 0x1ce   :  { %3822 = vmatpush1.bf16.msra.mxu0 %v3821_v21  ;;  %v836_v21 = vld [vmem:[#allocation9 + $0x6a0] sm:$0xff] }
 0x1cf   :  { %3824 = vmatprep.subr.bf16.mxu0 %v3823_v22  ;;  %v838_v22 = vld [vmem:[#allocation9 + $0x6b0] sm:$0xff] }
 0x1d0   :  { %v3865_v25 = vpack.c.bf16 %v838_v22, %v836_v21  ;;  %v1175_v21 = vlaneseq }
 0x1d2   :  { %3826 = vmatpush1.bf16.msra.mxu0 %v3825_v27  ;;  %v840_v27 = vld [vmem:[#allocation9 + $0x6c0] sm:$0xff]  ;;  %v4229_v22 = vshrl.u32 %v1175_v21, 7 }
 0x1d3   :  { %3828 = vmatprep.subr.bf16.mxu0 %v3827_v28  ;;  %v842_v28 = vld [vmem:[#allocation9 + $0x6d0] sm:$0xff] }
 0x1d4   :  { %v3869_v31 = vpack.c.bf16 %v842_v28, %v840_v27  ;;  %v1177_v23 = vsub.s32 0, %v4229_v22 }
 0x1d6   :  { %3830 = vmatpush1.bf16.msra.mxu0 %v3829_v33  ;;  %v844_v33 = vld [vmem:[#allocation9 + $0x6e0] sm:$0xff] }
 0x1d7   :  { %3832 = vmatprep.subr.bf16.mxu0 %v3831_v34  ;;  %v846_v34 = vld [vmem:[#allocation9 + $0x6f0] sm:$0xff] }
 0x1d8   :  { %v3873_v37 = vpack.c.bf16 %v846_v34, %v844_v33 }
 0x1da   :  { %3834 = vmatpush1.bf16.msra.mxu0 %v3833_v39  ;;  %v848_v39 = vld [vmem:[#allocation9 + $0x700] sm:$0xff] }
 0x1db   :  { %3836 = vmatprep.subr.bf16.mxu0 %v3835_v40  ;;  %v850_v40 = vld [vmem:[#allocation9 + $0x710] sm:$0xff] }
 0x1dc   :  { %v3877_v44 = vpack.c.bf16 %v850_v40, %v848_v39 }
 0x1de   :  { %3838 = vmatpush1.bf16.msra.mxu0 %v3837_v46  ;;  %v852_v46 = vld [vmem:[#allocation9 + $0x720] sm:$0xff] }
 0x1df   :  { %3840 = vmatprep.subr.bf16.mxu0 %v3839_v47  ;;  %v854_v47 = vld [vmem:[#allocation9 + $0x730] sm:$0xff] }
 0x1e0   :  { %v3881_v50 = vpack.c.bf16 %v854_v47, %v852_v46 }
 0x1e2   :  { %3842 = vmatpush1.bf16.msra.mxu0 %v3841_v52  ;;  %v4225_v59 = vpop.f32.mrb[4].mxu1  ;;  %v856_v52 = vld [vmem:[#allocation9 + $0x740] sm:$0xff] }
 0x1e3   :  { %3844 = vmatprep.subr.bf16.mxu0 %v3843_v53  ;;  %v619_v62 = vpop.f32.mrb[5].mxu1  ;;  %v858_v53 = vld [vmem:[#allocation9 + $0x750] sm:$0xff] }
 0x1e4   :  { %v3885_v57 = vpack.c.bf16 %v858_v53, %v856_v52 }
 0x1e5   :  { %1087 = vmatmul.mubr.f32.vlgmr.msra.gmra.mrb[2].mxu0 %v4223_v55  ;;  %v3859_v55 = vpack.c.bf16 %v835_v12, %v833_v11  ;;  %v872_v12 = vld [vmem:[#allocation9 + $0x7c0] sm:$0xff] }
 0x1e6   :  { %3846 = vmatpush1.bf16.msra.mxu0 %v3845_v58  ;;  %1157 = vmatprep.mubr.f32.mxu0 %v619_v62  ;;  %v860_v58 = vld [vmem:[#allocation9 + $0x760] sm:$0xff] }
 0x1e7   :  { %3848 = vmatprep.subr.bf16.mxu0 %v3847_v60  ;;  %v862_v60 = vld [vmem:[#allocation9 + $0x770] sm:$0xff] }
 0x1e8   :  { %v3889_v62 = vpack.c.bf16 %v862_v60, %v860_v58  ;;  %v1299_v58 = vunpack.c.0.s8 %v1298_v49 }
 0x1ea   :  { %3850 = vmatpush1.bf16.msra.mxu0 %v3849_v1  ;;  %v866_v1 = vld [vmem:[#allocation9 + $0x790] sm:$0xff] }
 0x1eb   :  { %3852 = vmatprep.subr.bf16.mxu0 %v3851_v2  ;;  %v869_v2 = vld [vmem:[#allocation9 + $0x7a8] sm:$0xff]  ;;  %v3893_v4 = vpack.c.bf16 %v866_v1, %v864_v0 }
 0x1ec   :  { %v3895_v5 = vpack.c.bf16 %v871_v3, %v869_v2 }
 0x1ee   :  { %3854 = vmatpush1.bf16.msra.mxu0 %v3853_v7  ;;  %v870_v7 = vld [vmem:[#allocation9 + $0x7b0] sm:$0xff] }
 0x1ef   :  { %3856 = vmatprep.subr.bf16.mxu0 %v3855_v8  ;;  %v873_v8 = vld [vmem:[#allocation9 + $0x7c8] sm:$0xff]  ;;  %v3897_v10 = vpack.c.bf16 %v870_v7, %v868_v6 }
 0x1f0   :  { %v3899_v11 = vpack.c.bf16 %v875_v9, %v873_v8 }
 0x1f2   :  { %3858 = vmatpush1.bf16.msra.mxu0 %v3857_v13  ;;  %v874_v13 = vld [vmem:[#allocation9 + $0x7d0] sm:$0xff] }
 0x1f3   :  { %3860 = vmatprep.subr.bf16.mxu0 %v3859_v55  ;;  %v877_v55 = vld [vmem:[#allocation9 + $0x7e8] sm:$0xff]  ;;  %v3901_v16 = vpack.c.bf16 %v874_v13, %v872_v12 }
 0x1f4   :  { %v3903_v17 = vpack.c.bf16 %v879_v15, %v877_v55 }
 0x1f6   :  { %3862 = vmatpush1.bf16.msra.mxu0 %v3861_v19  ;;  %v878_v19 = vld [vmem:[#allocation9 + $0x7f0] sm:$0xff] }
 0x1f7   :  { %3864 = vmatprep.subr.bf16.mxu0 %v3863_v20  ;;  %v3905_v20 = vpack.c.bf16 %v878_v19, %v876_v18 }
 0x1fa   :  { %3866 = vmatpush1.bf16.msra.mxu0 %v3865_v25  ;;  %v1178_v25 = vrot.slane %v1173_v24, %v1177_v23 }
 0x1fb   :  { %3868 = vmatprep.subr.bf16.mxu0 %v3867_v26 }
 0x1fe   :  { %3870 = vmatpush1.bf16.msra.mxu0 %v3869_v31  ;;  %v1503_v31 = vld [vmem:[#allocation6] sm:$0xff] }
 0x1ff   :  { %3872 = vmatprep.subr.bf16.mxu0 %v3871_v32  ;;  %3287 = vmatprep.mubr.msk.f32.mxu1 %vm1519_vm0, %v1503_v31 }
 0x202   :  { %3874 = vmatpush1.bf16.msra.mxu0 %v3873_v37 }
 0x203   :  { %3876 = vmatprep.subr.bf16.mxu0 %v3875_v38  ;;  %v4128_v38 = vmov 1983009808  }
 0x204   :  { %v1234_v39 = vunpack.c.l.s4 %v4128_v38 }
 0x206   :  { %3878 = vmatpush1.bf16.msra.mxu0 %v3877_v44  ;;  %v1235_v43 = vunpack.c.0.s8 %v1234_v39 }
 0x207   :  { %3880 = vmatprep.subr.bf16.mxu0 %v3879_v45 }
 0x208   :  { %v4280_v47 = vsub.s32 %v1235_v43, %v4229_v22 }
 0x20a   :  { %3882 = vmatpush1.bf16.msra.mxu0 %v3881_v50 }
 0x20b   :  { %3884 = vmatprep.subr.bf16.mxu0 %v3883_v51 }
 0x20e   :  { %3886 = vmatpush1.bf16.msra.mxu0 %v3885_v57 }
 0x20f   :  { %3888 = vmatprep.subr.bf16.mxu0 %v3887_v41 }
 0x212   :  { %3890 = vmatpush1.bf16.msra.mxu0 %v3889_v62 }
 0x213   :  { %3892 = vmatprep.subr.bf16.mxu0 %v3891_v63 }
 0x216   :  { %3894 = vmatpush1.bf16.msra.mxu0 %v3893_v4 }
 0x217   :  { %3896 = vmatprep.subr.bf16.mxu0 %v3895_v5  ;;  %v4296_v5 = vsub.s32 %v1299_v58, %v4229_v22 }
 0x21a   :  { %3898 = vmatpush1.bf16.msra.mxu0 %v3897_v10 }
 0x21b   :  { %3900 = vmatprep.subr.bf16.mxu0 %v3899_v11 }
 0x21e   :  { %3902 = vmatpush1.bf16.msra.mxu0 %v3901_v16 }
 0x21f   :  { %3904 = vmatprep.subr.bf16.mxu0 %v3903_v17 }
 0x222   :  { %3906 = vmatpush1.bf16.msra.mxu0 %v3905_v20 }
 0x225   :  { %1158 = vmatmul.mubr.f32.vlgmr.msra.gmra.mrb[2].mxu0 %v4225_v59  ;;  %v1181_v59 = vsub.s32 1, %v4229_v22 }
 0x227   :  { %v1182_v29 = vrot.slane %v1173_v24, %v1181_v59 }
 0x2f8   :  { %v1159_v26 = vpop.f32.mrb[2].mxu0 }
 0x2f9   :  { %v4235_v27 = vadd.f32 %v1178_v25, %v1159_v26  ;;  %v1161_v28 = vpop.f32.mrb[3].mxu0 }
 0x2fa   :  { %v4250_v30 = vadd.f32 %v1182_v29, %v1161_v28 }
 0x2fb   :  { %1194 = vrot.lane.b32.xlu1 %v4235_v27, %s4123_s19  ;;  %1188 = vrot.lane.b32.xlu0 %v4235_v27, %s4124_s20 }
 0x2ff   :  { %1197 = vrot.lane.b32.xlu1 %v4235_v27, %s4119_s28  ;;  %1191 = vrot.lane.b32.xlu0 %v4235_v27, %s4125_s21 }
 0x303   :  { %1203 = vrot.lane.b32.xlu1 %v4235_v27, %s4126_s4  ;;  %1200 = vrot.lane.b32.xlu0 %v4235_v27, %s4127_s22 }
 0x307   :  { %1206 = vrot.lane.b32.xlu0 %v4235_v27, %s4122_s10  ;;  %1210 = vrot.lane.b32.xlu1 %v4250_v30, %s4124_s20 }
 0x30b   :  { %1213 = vrot.lane.b32.xlu0 %v4250_v30, %s4125_s21  ;;  %1216 = vrot.lane.b32.xlu1 %v4250_v30, %s4123_s19 }
 0x30f   :  { %1219 = vrot.lane.b32.xlu0 %v4250_v30, %s4119_s28  ;;  %1222 = vrot.lane.b32.xlu1 %v4250_v30, %s4127_s22 }
 0x313   :  { %1225 = vrot.lane.b32.xlu0 %v4250_v30, %s4126_s4  ;;  %1228 = vrot.lane.b32.xlu1 %v4250_v30, %s4122_s10 }
 0x36d   :  { %v4269_v32 = vpop.permute.xlu1 %1194  ;;  %v4271_v33 = vpop.permute.xlu0 %1188 }
 0x36e   :  { %v1247_v54 = vcombine.low %v4271_v33, %v4269_v32 }
 0x370   :  { %v1255_v63 = vrot.slane %v1247_v54, %v4280_v47 }
 0x371   :  { %v4273_v34 = vpop.permute.xlu1 %1197  ;;  %v4275_v35 = vpop.permute.xlu0 %1191 }
 0x372   :  { %v1231_v50 = vcombine.low %v4235_v27, %v4275_v35  ;;  %v1232_v12 = vcombine.high %v4235_v27, %v4275_v35 }
 0x374   :  { %v1239_v60 = vrot.slane %v1231_v50, %v4280_v47 }
 0x375   :  { %v4277_v36 = vpop.permute.xlu1 %1203  ;;  %v1201_v37 = vpop.permute.xlu0 %1200 }
 0x376   :  { %v1263_v51 = vcombine.low %v4273_v34, %v4277_v36  ;;  %v1295_v6 = vcombine.low %v1239_v60, %v1255_v63  ;;  %v1296_v24 = vcombine.high %v1239_v60, %v1255_v63  ;;  %v1264_v25 = vcombine.high %v4273_v34, %v4277_v36 }
 0x378   :  { %v1271_v14 = vrot.slane %v1263_v51, %v4280_v47  ;;  %v1303_v16 = vrot.slane %v1295_v6, %v4296_v5  ;;  %v1310_v43 = vrot.slane %v1296_v24, %v4296_v5 }
 0x379   :  { %v1207_v40 = vpop.permute.xlu0 %1206  ;;  %v1211_v42 = vpop.permute.xlu1 %1210 }
 0x37a   :  { %v1279_v44 = vcombine.low %v1201_v37, %v1207_v40  ;;  %v1280_v17 = vcombine.high %v1201_v37, %v1207_v40 }
 0x37c   :  { %v1287_v56 = vrot.slane %v1279_v44, %v4280_v47  ;;  %v1294_v35 = vrot.slane %v1280_v17, %v4280_v47  ;;  %v1278_v44 = vrot.slane %v1264_v25, %v4280_v47  ;;  %v1514_v25 = vld [vmem:[#allocation6 + $0x58] sm:$0xff] }
 0x37d   :  { %v1214_v45 = vpop.permute.xlu0 %1213  ;;  %v1217_v46 = vpop.permute.xlu1 %1216 }
 0x37e   :  { %v1367_v52 = vcombine.low %v4250_v30, %v1214_v45  ;;  %v1383_v53 = vcombine.low %v1211_v42, %v1217_v46  ;;  %v1327_v0 = vcombine.low %v1271_v14, %v1287_v56  ;;  %v1328_v18 = vcombine.high %v1271_v14, %v1287_v56 }
 0x37f   :  { %v1368_v19 = vcombine.high %v4250_v30, %v1214_v45  ;;  %v1384_v20 = vcombine.high %v1211_v42, %v1217_v46  ;;  %v1248_v30 = vcombine.high %v4271_v33, %v4269_v32  ;;  %v1246_v42 = vrot.slane %v1232_v12, %v4280_v47  ;;  %v1504_v46 = vld [vmem:[#allocation6 + $0x8] sm:$0xff]  ;;  %v1510_v12 = vld [vmem:[#allocation6 + $0x38] sm:$0xff] }
 0x380   :  { %v1375_v61 = vrot.slane %v1367_v52, %v4280_v47  ;;  %v1391_v62 = vrot.slane %v1383_v53, %v4280_v47  ;;  %v1335_v10 = vrot.slane %v1327_v0, %v4296_v5  ;;  %v1342_v37 = vrot.slane %v1328_v18, %v4296_v5  ;;  %v1505_v52 = vld [vmem:[#allocation6 + $0x10] sm:$0xff] }
 0x381   :  { %v1220_v57 = vpop.permute.xlu0 %1219  ;;  %v1223_v41 = vpop.permute.xlu1 %1222  ;;  %v1382_v38 = vrot.slane %v1368_v19, %v4280_v47  ;;  %v1398_v34 = vrot.slane %v1384_v20, %v4280_v47  ;;  %v1262_v48 = vrot.slane %v1248_v30, %v4280_v47  ;;  %v1343_v49 = vcombine.low %v1278_v44, %v1294_v35  ;;  %v1512_v20 = vld [vmem:[#allocation6 + $0x48] sm:$0xff] }
 0x382   :  { %v1431_v7 = vcombine.low %v1375_v61, %v1391_v62  ;;  %v1432_v21 = vcombine.high %v1375_v61, %v1391_v62  ;;  %v1359_v27 = vcombine.low %v1303_v16, %v1335_v10  ;;  %v1360_v40 = vcombine.high %v1303_v16, %v1335_v10  ;;  %v1507_v61 = vld [vmem:[#allocation6 + $0x20] sm:$0xff] }
 0x383   :  { %v1447_v50 = vcombine.low %v1382_v38, %v1398_v34  ;;  %v1361_v51 = vcombine.low %v1310_v43, %v1342_v37  ;;  %v1311_v53 = vcombine.low %v1246_v42, %v1262_v48  ;;  %v1351_v58 = vrot.slane %v1343_v49, %v4296_v5  ;;  %v1511_v16 = vld [vmem:[#allocation6 + $0x40] sm:$0xff] }
 0x384   :  { %v1439_v22 = vrot.slane %v1431_v7, %v4296_v5  ;;  %v1446_v36 = vrot.slane %v1432_v21, %v4296_v5  ;;  %v1362_v14 = vcombine.high %v1310_v43, %v1342_v37  ;;  %v1509_v7 = vld [vmem:[#allocation6 + $0x30] sm:$0xff] }
 0x385   :  { %v1226_v1 = vpop.permute.xlu0 %1225  ;;  %v1229_v2 = vpop.permute.xlu1 %1228  ;;  %v1455_v60 = vrot.slane %v1447_v50, %v4296_v5  ;;  %v1319_v62 = vrot.slane %v1311_v53, %v4296_v5 }
 0x386   :  { %v1399_v3 = vcombine.low %v1220_v57, %v1226_v1  ;;  %v1415_v4 = vcombine.low %v1223_v41, %v1229_v2  ;;  %v1400_v11 = vcombine.high %v1220_v57, %v1226_v1  ;;  %v1416_v13 = vcombine.high %v1223_v41, %v1229_v2  ;;  %v1506_v41 = vld [vmem:[#allocation6 + $0x18] sm:$0xff]  ;;  %v1508_v2 = vld [vmem:[#allocation6 + $0x28] sm:$0xff] }
 0x387   :  { %v1363_v6 = vcombine.low %v1319_v62, %v1351_v58 }
 0x388   :  { %v1407_v8 = vrot.slane %v1399_v3, %v4280_v47  ;;  %v1423_v9 = vrot.slane %v1415_v4, %v4280_v47  ;;  %v1414_v26 = vrot.slane %v1400_v11, %v4280_v47  ;;  %v1430_v28 = vrot.slane %v1416_v13, %v4280_v47 }
 0x389   :  { %v1344_v3 = vcombine.high %v1278_v44, %v1294_v35  ;;  %v1448_v4 = vcombine.high %v1382_v38, %v1398_v34 }
 0x38a   :  { %v1463_v55 = vcombine.low %v1407_v8, %v1423_v9  ;;  %v1464_v15 = vcombine.high %v1407_v8, %v1423_v9  ;;  %v1479_v32 = vcombine.low %v1414_v26, %v1430_v28  ;;  %v1480_v63 = vcombine.high %v1414_v26, %v1430_v28 }
 0x38b   :  { %v1312_v8 = vcombine.high %v1246_v42, %v1262_v48  ;;  %v1358_v13 = vrot.slane %v1344_v3, %v4296_v5 }
 0x38c   :  { %v1471_v23 = vrot.slane %v1463_v55, %v4296_v5  ;;  %v1478_v59 = vrot.slane %v1464_v15, %v4296_v5  ;;  %v1487_v54 = vrot.slane %v1479_v32, %v4296_v5  ;;  %v1494_v9 = vrot.slane %v1480_v63, %v4296_v5 }
 0x38d   :  { %v1462_v55 = vrot.slane %v1448_v4, %v4296_v5  ;;  %v1364_v15 = vcombine.high %v1319_v62, %v1351_v58  ;;  %v1326_v17 = vrot.slane %v1312_v8, %v4296_v5 }
 0x38e   :  { %v1495_v29 = vcombine.low %v1439_v22, %v1471_v23  ;;  %v1496_v31 = vcombine.high %v1439_v22, %v1471_v23  ;;  %v1497_v45 = vcombine.low %v1446_v36, %v1478_v59  ;;  %v1498_v57 = vcombine.high %v1446_v36, %v1478_v59  ;;  %v1513_v22 = vld [vmem:[#allocation6 + $0x50] sm:$0xff]  ;;  %v1516_v59 = vld [vmem:[#allocation6 + $0x68] sm:$0xff] }
 0x38f   :  { %v1499_v1 = vcombine.low %v1455_v60, %v1487_v54  ;;  %v1500_v11 = vcombine.high %v1455_v60, %v1487_v54  ;;  %v1501_v19 = vcombine.low %v1462_v55, %v1494_v9  ;;  %v1365_v21 = vcombine.low %v1326_v17, %v1358_v13 }
 0x390   :  { %v4319_v39 = vpack.c.bf16 %v1495_v29, %v1359_v27  ;;  %v4325_v33 = vpack.c.bf16 %v1496_v31, %v1360_v40  ;;  %v4332_v56 = vpack.c.bf16 %v1497_v45, %v1361_v51  ;;  %v4341_v0 = vpack.c.bf16 %v1498_v57, %v1362_v14  ;;  %v1515_v27 = vld [vmem:[#allocation6 + $0x60] sm:$0xff]  ;;  %v1517_v29 = vld [vmem:[#allocation6 + $0x70] sm:$0xff]  ;;  %v1518_v31 = vld [vmem:[#allocation6 + $0x78] sm:$0xff] }
 0x391   :  { %v4348_v10 = vpack.c.bf16 %v1499_v1, %v1363_v6  ;;  %v3927_v18 = vpack.c.bf16 %v1500_v11, %v1364_v15  ;;  %v3931_v23 = vpack.c.bf16 %v1501_v19, %v1365_v21  ;;  %v1502_v24 = vcombine.high %v1462_v55, %v1494_v9 }
 0x392   :  { %3908 = vmatprep.subr.bf16.mxu1 %v4319_v39  ;;  %v1366_v26 = vcombine.high %v1326_v17, %v1358_v13 }
 0x393   :  { %3910 = vmatpush3.bf16.msra.mxu1 %v4319_v39 }
 0x394   :  { %3912 = vmatprep.subr.bf16.mxu1 %v4325_v33  ;;  %v3935_v28 = vpack.c.bf16 %v1502_v24, %v1366_v26 }
 0x396   :  { %3288 = vmatmul.mubr.msk.f32.vlgmr.msra.gmra.mrb[6].mxu1 %vm1519_vm0, %v1504_v46 }
 0x397   :  { %3914 = vmatpush3.bf16.msra.mxu1 %v4325_v33  ;;  %3294 = vmatprep.mubr.msk.f32.mxu1 %vm1519_vm0, %v1505_v52 }
 0x398   :  { %3916 = vmatprep.subr.bf16.mxu1 %v4332_v56 }
 0x39a   :  { %3295 = vmatmul.mubr.msk.f32.vlgmr.msra.gmra.mrb[8].mxu1 %vm1519_vm0, %v1506_v41 }
 0x39b   :  { %3918 = vmatpush3.bf16.msra.mxu1 %v4332_v56  ;;  %3301 = vmatprep.mubr.msk.f32.mxu1 %vm1519_vm0, %v1507_v61 }
 0x39c   :  { %3920 = vmatprep.subr.bf16.mxu1 %v4341_v0 }
 0x39e   :  { %3302 = vmatmul.mubr.msk.f32.vlgmr.msra.gmra.mrb[10].mxu1 %vm1519_vm0, %v1508_v2 }
 0x39f   :  { %3922 = vmatpush3.bf16.msra.mxu1 %v4341_v0  ;;  %3308 = vmatprep.mubr.msk.f32.mxu1 %vm1519_vm0, %v1509_v7 }
 0x3a0   :  { %3924 = vmatprep.subr.bf16.mxu1 %v4348_v10 }
 0x3a2   :  { %3309 = vmatmul.mubr.msk.f32.vlgmr.msra.gmra.mrb[12].mxu1 %vm1519_vm0, %v1510_v12 }
 0x3a3   :  { %3926 = vmatpush3.bf16.msra.mxu1 %v4348_v10  ;;  %3315 = vmatprep.mubr.msk.f32.mxu1 %vm1519_vm0, %v1511_v16 }
 0x3a4   :  { %3928 = vmatprep.subr.bf16.mxu1 %v3927_v18 }
 0x3a6   :  { %3316 = vmatmul.mubr.msk.f32.vlgmr.msra.gmra.mrb[14].mxu1 %vm1519_vm0, %v1512_v20 }
 0x3a7   :  { %3930 = vmatpush3.bf16.msra.mxu1 %v3927_v18  ;;  %3322 = vmatprep.mubr.msk.f32.mxu1 %vm1519_vm0, %v1513_v22 }
 0x3a8   :  { %3932 = vmatprep.subr.bf16.mxu1 %v3931_v23 }
 0x3aa   :  { %3323 = vmatmul.mubr.msk.f32.vlgmr.msra.gmra.mrb[16].mxu1 %vm1519_vm0, %v1514_v25 }
 0x3ab   :  { %3934 = vmatpush3.bf16.msra.mxu1 %v3931_v23  ;;  %3329 = vmatprep.mubr.msk.f32.mxu1 %vm1519_vm0, %v1515_v27 }
 0x3ac   :  { %3936 = vmatprep.subr.bf16.mxu1 %v3935_v28 }
 0x3ae   :  { %3330 = vmatmul.mubr.msk.f32.vlgmr.msra.gmra.mrb[18].mxu1 %vm1519_vm0, %v1516_v59 }
 0x3af   :  { %3938 = vmatpush3.bf16.msra.mxu1 %v3935_v28  ;;  %3336 = vmatprep.mubr.msk.f32.mxu1 %vm1519_vm0, %v1517_v29 }
 0x3b0   :  { %3940 = vmatprep.subr.bf16.mxu1 %v4319_v39 }
 0x3b2   :  { %3337 = vmatmul.mubr.msk.f32.vlgmr.msra.gmra.mrb[20].mxu1 %vm1519_vm0, %v1518_v31 }
 0x3b3   :  { %3942 = vmatpush3.bf16.msra.mxu1 %v4319_v39 }
 0x3b4   :  { %3944 = vmatprep.subr.bf16.mxu1 %v4325_v33 }
 0x469   :  { %v3289_v30 = vpop.f32.mrb[6].mxu1 }
 0x46a   :  { %v1592_v35 = vpop.f32.mrb[7].mxu1 }
 0x46b   :  { %3343 = vmatprep.mubr.msk.f32.mxu1 %vm1519_vm0, %v1592_v35 }
 0x46c   :  { %3344 = vmatmul.mubr.msk.f32.vlgmr.msra.gmra.mrb[22].mxu1 %vm1519_vm0, %v3289_v30 }
 0x46d   :  { %3946 = vmatpush3.bf16.msra.mxu1 %v4325_v33  ;;  %v3296_v37 = vpop.f32.mrb[8].mxu1 }
 0x46e   :  { %3948 = vmatprep.subr.bf16.mxu1 %v4332_v56  ;;  %v1673_v38 = vpop.f32.mrb[9].mxu1 }
 0x46f   :  { %3350 = vmatprep.mubr.msk.f32.mxu1 %vm1519_vm0, %v1673_v38 }
 0x470   :  { %3351 = vmatmul.mubr.msk.f32.vlgmr.msra.gmra.mrb[24].mxu1 %vm1519_vm0, %v3296_v37 }
 0x471   :  { %3950 = vmatpush3.bf16.msra.mxu1 %v4332_v56  ;;  %v3303_v34 = vpop.f32.mrb[10].mxu1 }
 0x472   :  { %3952 = vmatprep.subr.bf16.mxu1 %v4341_v0  ;;  %v1754_v36 = vpop.f32.mrb[11].mxu1 }
 0x473   :  { %3357 = vmatprep.mubr.msk.f32.mxu1 %vm1519_vm0, %v1754_v36 }
 0x474   :  { %3358 = vmatmul.mubr.msk.f32.vlgmr.msra.gmra.mrb[26].mxu1 %vm1519_vm0, %v3303_v34 }
 0x475   :  { %3954 = vmatpush3.bf16.msra.mxu1 %v4341_v0  ;;  %v3310_v39 = vpop.f32.mrb[12].mxu1 }
 0x476   :  { %3956 = vmatprep.subr.bf16.mxu1 %v4348_v10  ;;  %v1835_v40 = vpop.f32.mrb[13].mxu1 }
 0x477   :  { %3364 = vmatprep.mubr.msk.f32.mxu1 %vm1519_vm0, %v1835_v40 }
 0x478   :  { %3365 = vmatmul.mubr.msk.f32.vlgmr.msra.gmra.mrb[28].mxu1 %vm1519_vm0, %v3310_v39 }
 0x479   :  { %3958 = vmatpush3.bf16.msra.mxu1 %v4348_v10  ;;  %v3317_v42 = vpop.f32.mrb[14].mxu1 }
 0x47a   :  { %3960 = vmatprep.subr.bf16.mxu1 %v3927_v18  ;;  %v1916_v43 = vpop.f32.mrb[15].mxu1 }
 0x47b   :  { %3371 = vmatprep.mubr.msk.f32.mxu1 %vm1519_vm0, %v1916_v43 }
 0x47c   :  { %3372 = vmatmul.mubr.msk.f32.vlgmr.msra.gmra.mrb[30].mxu1 %vm1519_vm0, %v3317_v42 }
 0x47d   :  { %3962 = vmatpush3.bf16.msra.mxu1 %v3927_v18  ;;  %v3324_v44 = vpop.f32.mrb[16].mxu1 }
 0x47e   :  { %3964 = vmatprep.subr.bf16.mxu1 %v3931_v23  ;;  %v1997_v32 = vpop.f32.mrb[17].mxu1 }
 0x47f   :  { %3378 = vmatprep.mubr.msk.f32.mxu1 %vm1519_vm0, %v1997_v32 }
 0x480   :  { %3379 = vmatmul.mubr.msk.f32.vlgmr.msra.gmra.mrb[32].mxu1 %vm1519_vm0, %v3324_v44 }
 0x481   :  { %3966 = vmatpush3.bf16.msra.mxu1 %v3931_v23  ;;  %v3331_v33 = vpop.f32.mrb[18].mxu1 }
 0x482   :  { %3968 = vmatprep.subr.bf16.mxu1 %v3935_v28  ;;  %v2078_v45 = vpop.f32.mrb[19].mxu1 }
 0x483   :  { %3385 = vmatprep.mubr.msk.f32.mxu1 %vm1519_vm0, %v2078_v45 }
 0x484   :  { %3386 = vmatmul.mubr.msk.f32.vlgmr.msra.gmra.mrb[34].mxu1 %vm1519_vm0, %v3331_v33 }
 0x485   :  { %3970 = vmatpush3.bf16.msra.mxu1 %v3935_v28  ;;  %v3338_v46 = vpop.f32.mrb[20].mxu1 }
 0x486   :  { %v2159_v48 = vpop.f32.mrb[21].mxu1 }
 0x487   :  { %3392 = vmatprep.mubr.msk.f32.mxu1 %vm1519_vm0, %v2159_v48 }
 0x488   :  { %3393 = vmatmul.mubr.msk.f32.vlgmr.msra.gmra.mrb[36].mxu1 %vm1519_vm0, %v3338_v46 }
 0x53f   :  { %v3345_v49 = vpop.f32.mrb[22].mxu1 }
 0x540   :  { %v2240_v50 = vpop.f32.mrb[23].mxu1 }
 0x543   :  { %v3352_v51 = vpop.f32.mrb[24].mxu1 }
 0x544   :  { %v2321_v52 = vpop.f32.mrb[25].mxu1 }
 0x547   :  { %v3359_v53 = vpop.f32.mrb[26].mxu1 }
 0x548   :  { %v2952_v54 = vcombine.low %v3345_v49, %v3359_v53  ;;  %v2953_v56 = vcombine.high %v3345_v49, %v3359_v53  ;;  %v2402_v57 = vpop.f32.mrb[27].mxu1 }
 0x549   :  { %v2816_v41 = vcombine.low %v2240_v50, %v2402_v57  ;;  %v2817_v58 = vcombine.high %v2240_v50, %v2402_v57 }
 0x54a   :  { %v2960_v1 = vrot.slane %v2952_v54, %v4280_v47  ;;  %v2967_v2 = vrot.slane %v2953_v56, %v4280_v47 }
 0x54b   :  { %v3366_v60 = vpop.f32.mrb[28].mxu1  ;;  %v2824_v6 = vrot.slane %v2816_v41, %v4280_v47  ;;  %v2831_v7 = vrot.slane %v2817_v58, %v4280_v47 }
 0x54c   :  { %v2968_v14 = vcombine.low %v3352_v51, %v3366_v60  ;;  %v2969_v61 = vcombine.high %v3352_v51, %v3366_v60  ;;  %v2483_v62 = vpop.f32.mrb[29].mxu1 }
 0x54d   :  { %v2832_v63 = vcombine.low %v2321_v52, %v2483_v62  ;;  %v2833_v0 = vcombine.high %v2321_v52, %v2483_v62 }
 0x54e   :  { %v2976_v3 = vrot.slane %v2968_v14, %v4280_v47  ;;  %v2983_v4 = vrot.slane %v2969_v61, %v4280_v47 }
 0x54f   :  { %v2840_v8 = vrot.slane %v2832_v63, %v4280_v47  ;;  %v2847_v9 = vrot.slane %v2833_v0, %v4280_v47  ;;  %v3373_v10 = vpop.f32.mrb[30].mxu1 }
 0x550   :  { %v3017_v11 = vcombine.high %v2960_v1, %v2976_v3  ;;  %v3033_v12 = vcombine.high %v2967_v2, %v2983_v4  ;;  %v2564_v13 = vpop.f32.mrb[31].mxu1  ;;  %v3016_v55 = vcombine.low %v2960_v1, %v2976_v3  ;;  %v3032_v15 = vcombine.low %v2967_v2, %v2983_v4 }
 0x551   :  { %v2881_v16 = vcombine.high %v2824_v6, %v2840_v8  ;;  %v2897_v17 = vcombine.high %v2831_v7, %v2847_v9  ;;  %v2880_v18 = vcombine.low %v2824_v6, %v2840_v8  ;;  %v2896_v19 = vcombine.low %v2831_v7, %v2847_v9 }
 0x552   :  { %v4401_v59 = vrot.slane %v3016_v55, %v4296_v5  ;;  %v3031_v29 = vrot.slane %v3017_v11, %v4296_v5  ;;  %v3040_v31 = vrot.slane %v3032_v15, %v4296_v5  ;;  %v3047_v30 = vrot.slane %v3033_v12, %v4296_v5 }
 0x553   :  { %v3380_v20 = vpop.f32.mrb[32].mxu1  ;;  %v4407_v34 = vrot.slane %v2880_v18, %v4296_v5  ;;  %v2895_v36 = vrot.slane %v2881_v16, %v4296_v5  ;;  %v2904_v42 = vrot.slane %v2896_v19, %v4296_v5  ;;  %v2911_v43 = vrot.slane %v2897_v17, %v4296_v5 }
 0x554   :  { %v2645_v21 = vpop.f32.mrb[33].mxu1 }
 0x557   :  { %v3387_v22 = vpop.f32.mrb[34].mxu1 }
 0x558   :  { %v2984_v23 = vcombine.low %v3373_v10, %v3387_v22  ;;  %v2985_v24 = vcombine.high %v3373_v10, %v3387_v22  ;;  %v2726_v25 = vpop.f32.mrb[35].mxu1 }
 0x559   :  { %v2848_v26 = vcombine.low %v2564_v13, %v2726_v25  ;;  %v2849_v27 = vcombine.high %v2564_v13, %v2726_v25 }
 0x55a   :  { %v2992_v44 = vrot.slane %v2984_v23, %v4280_v47  ;;  %v2999_v32 = vrot.slane %v2985_v24, %v4280_v47 }
 0x55b   :  { %v3394_v28 = vpop.f32.mrb[36].mxu1  ;;  %v2856_v46 = vrot.slane %v2848_v26, %v4280_v47  ;;  %v2863_v48 = vrot.slane %v2849_v27, %v4280_v47 }
 0x55c   :  { %v3000_v35 = vcombine.low %v3380_v20, %v3394_v28  ;;  %v3001_v37 = vcombine.high %v3380_v20, %v3394_v28  ;;  %v2807_v38 = vpop.f32.mrb[37].mxu1 }
 0x55d   :  { %v2864_v39 = vcombine.low %v2645_v21, %v2807_v38  ;;  %v2865_v40 = vcombine.high %v2645_v21, %v2807_v38 }
 0x55e   :  { %v3008_v33 = vrot.slane %v3000_v35, %v4280_v47  ;;  %v3015_v45 = vrot.slane %v3001_v37, %v4280_v47 }
 0x55f   :  { %v2872_v49 = vrot.slane %v2864_v39, %v4280_v47  ;;  %v2879_v50 = vrot.slane %v2865_v40, %v4280_v47 }
 0x560   :  { %v3049_v51 = vcombine.high %v2992_v44, %v3008_v33  ;;  %v3065_v52 = vcombine.high %v2999_v32, %v3015_v45  ;;  %v3048_v53 = vcombine.low %v2992_v44, %v3008_v33  ;;  %v3064_v54 = vcombine.low %v2999_v32, %v3015_v45 }
 0x561   :  { %v2912_v56 = vcombine.low %v2856_v46, %v2872_v49  ;;  %v2913_v57 = vcombine.high %v2856_v46, %v2872_v49  ;;  %v2928_v41 = vcombine.low %v2863_v48, %v2879_v50  ;;  %v2929_v58 = vcombine.high %v2863_v48, %v2879_v50 }
 0x562   :  { %v3056_v60 = vrot.slane %v3048_v53, %v4296_v5  ;;  %v3063_v14 = vrot.slane %v3049_v51, %v4296_v5  ;;  %v3072_v61 = vrot.slane %v3064_v54, %v4296_v5  ;;  %v3079_v62 = vrot.slane %v3065_v52, %v4296_v5 }
 0x563   :  { %v2920_v63 = vrot.slane %v2912_v56, %v4296_v5  ;;  %v2927_v47 = vrot.slane %v2913_v57, %v4296_v5  ;;  %v2936_v0 = vrot.slane %v2928_v41, %v4296_v5  ;;  %v2943_v1 = vrot.slane %v2929_v58, %v4296_v5 }
 0x564   :  { %v3081_v2 = vcombine.high %v4401_v59, %v3056_v60  ;;  %v3080_v3 = vcombine.low %v4401_v59, %v3056_v60  ;;  %v3082_v4 = vcombine.low %v3031_v29, %v3063_v14  ;;  %v3083_v6 = vcombine.high %v3031_v29, %v3063_v14 }
 0x565   :  { %v2945_v7 = vcombine.high %v4407_v34, %v2920_v63  ;;  %v2944_v8 = vcombine.low %v4407_v34, %v2920_v63  ;;  %v2946_v9 = vcombine.low %v2895_v36, %v2927_v47  ;;  %v2947_v10 = vcombine.high %v2895_v36, %v2927_v47 }
 0x566   :  { %3117 = vrot.lane.b32.xlu1 %v3081_v2, %s4122_s10  ;;  %v3084_v11 = vcombine.low %v3040_v31, %v3072_v61  ;;  %v2948_v12 = vcombine.low %v2904_v42, %v2936_v0  ;;  %v3085_v13 = vcombine.high %v3040_v31, %v3072_v61  ;;  %v2949_v55 = vcombine.high %v2904_v42, %v2936_v0 }
 0x567   :  { %3089 = vrot.lane.b32.xlu0 %v2945_v7, %s4122_s10  ;;  %v3086_v5 = vcombine.low %v3047_v30, %v3079_v62  ;;  %v2950_v15 = vcombine.low %v2911_v43, %v2943_v1  ;;  %v3087_v16 = vcombine.high %v3047_v30, %v3079_v62  ;;  %v2951_v17 = vcombine.high %v2911_v43, %v2943_v1 }
 0x56a   :  { %3121 = vrot.lane.b32.xlu1 %v3082_v4, %s4126_s4 }
 0x56b   :  { %3093 = vrot.lane.b32.xlu0 %v2946_v9, %s4126_s4 }
 0x56e   :  { %3125 = vrot.lane.b32.xlu1 %v3083_v6, %s4127_s22 }
 0x56f   :  { %3097 = vrot.lane.b32.xlu0 %v2947_v10, %s4127_s22 }
 0x572   :  { %3129 = vrot.lane.b32.xlu1 %v3084_v11, %s4119_s28 }
 0x573   :  { %3101 = vrot.lane.b32.xlu0 %v2948_v12, %s4119_s28 }
 0x576   :  { %3133 = vrot.lane.b32.xlu1 %v3085_v13, %s4123_s19 }
 0x577   :  { %3105 = vrot.lane.b32.xlu0 %v2949_v55, %s4123_s19 }
 0x57a   :  { %3137 = vrot.lane.b32.xlu1 %v3086_v5, %s4125_s21 }
 0x57b   :  { %3109 = vrot.lane.b32.xlu0 %v2950_v15, %s4125_s21 }
 0x57e   :  { %3141 = vrot.lane.b32.xlu1 %v3087_v16, %s4124_s20 }
 0x57f   :  { %3113 = vrot.lane.b32.xlu0 %v2951_v17, %s4124_s20 }
 0x5d8   :  { %v3118_v18 = vpop.permute.xlu1 %3117 }
 0x5d9   :  { %v3090_v19 = vpop.permute.xlu0 %3089  ;;  %v3157_v28 = vsel %vm1519_vm0, %v3080_v3, %v3118_v18 }
 0x5da   :  { %v3144_v59 = vsel %vm1519_vm0, %v2944_v8, %v3090_v19 }
 0x5dc   :  { %v3122_v20 = vpop.permute.xlu1 %3121 }
 0x5dd   :  { %v3094_v21 = vpop.permute.xlu0 %3093  ;;  %v3158_v29 = vsel %vm3145_vm1, %v3157_v28, %v3122_v20 }
 0x5de   :  { %v3146_v30 = vsel %vm3145_vm1, %v3144_v59, %v3094_v21 }
 0x5e0   :  { %v3126_v22 = vpop.permute.xlu1 %3125 }
 0x5e1   :  { %v3098_v23 = vpop.permute.xlu0 %3097  ;;  %v3159_v35 = vsel %vm3147_vm2, %v3158_v29, %v3126_v22 }
 0x5e2   :  { %v3148_v38 = vsel %vm3147_vm2, %v3146_v30, %v3098_v23 }
 0x5e4   :  { %v3130_v24 = vpop.permute.xlu1 %3129 }
 0x5e5   :  { %v3102_v25 = vpop.permute.xlu0 %3101  ;;  %v3160_v34 = vsel %vm3149_vm3, %v3159_v35, %v3130_v24 }
 0x5e6   :  { %v3150_v36 = vsel %vm3149_vm3, %v3148_v38, %v3102_v25 }
 0x5e8   :  { %v3134_v26 = vpop.permute.xlu1 %3133 }
 0x5e9   :  { %v3106_v27 = vpop.permute.xlu0 %3105  ;;  %v3161_v39 = vsel %vm3151_vm4, %v3160_v34, %v3134_v26 }
 0x5ea   :  { %v3152_v40 = vsel %vm3151_vm4, %v3150_v36, %v3106_v27 }
 0x5ec   :  { %v3138_v31 = vpop.permute.xlu1 %3137 }
 0x5ed   :  { %v3110_v37 = vpop.permute.xlu0 %3109  ;;  %v3162_v42 = vsel %vm3153_vm5, %v3161_v39, %v3138_v31 }
 0x5ee   :  { %v3154_v44 = vsel %vm3153_vm5, %v3152_v40, %v3110_v37 }
 0x5f0   :  { %v3142_v43 = vpop.permute.xlu1 %3141 }
 0x5f1   :  { %v3163_v32 = vsel %vm3155_vm6, %v3162_v42, %v3142_v43  ;;  %v3114_v33 = vpop.permute.xlu0 %3113 }
 0x5f2   :  { %v3165_v45 = vmul.f32 0.0625, %v3163_v32  ;;  %v3156_v46 = vsel %vm3155_vm6, %v3154_v44, %v3114_v33 }
 0x5f3   :  { %v3164_v48 = vmul.f32 0.0625, %v3156_v46 }
 0x5f4   :  { %v3167_v49 = vmax.f32 %v3165_v45, 0.0 }
 0x5f5   :  { %v3166_v50 = vmax.f32 %v3164_v48, 0.0 }
 0x5f6   :  { %3169 = vst [vmem:[#allocation11 + $0x8] sm:$0xff] %v3167_v49 }
 0x5f7   :  { %3168 = vst [vmem:[#allocation11] sm:$0xff] %v3166_v50 }
 0x5f8   :  { %4094 = shalt.err (!%p4091_p8)
}
 0x5f9   :  { %s4095_s0 = scalar_lea.hbm %s4465_s5, 256 }
 0x5fa   :  { %p4096_p9 = scmp.ne.s32.totalorder %s4465_s5, %s4095_s0  ;;  %p4099_p10 = scmp.lt.u32.totalorder %s4095_s0, %s4465_s5 }
 0x5fc   :  { %p4101_p11 = pnand %p4099_p10, %p4096_p9 }
 0x5fe   :  { %4104 = shalt.err (!%p4101_p11)
}
 0x5ff   :  { %3179 = dma.vmem_to_hbm [thread:$0]  %s3177_s24, 256, %s4465_s5, [#allocation5]  }
 0x600   :  { %4111 = dma.done.wait [#allocation5], 256  }
 0x601   :  { %4112 = vsyncadd [#allocation5], 4294967040 }
 0x602   :  { %3183 = vsyncpa [#allocation4], 1 }
 0x603   :  { %3184 = vsyncpa [#allocation7], 1 }
 0x604   :  { %3185 = vsyncpa [#allocation10], 1 }
 0x605   :  { %3186 = vsyncpa [#allocation5], 1 }

</bundles_post_ra>
